<compile_context>
chip_gen: v7x
topology: tpu7x:2x2x1
jax: 0.10.0
libtpu: 0.0.40
codegen_flags: <defaults>
</compile_context>

<pallas_src>
import functools
import math

import jax
import jax.numpy as jnp
from jax import lax
from jax.experimental import pallas as pl
from jax.experimental.pallas import tpu as pltpu

_SUBLANE = 8
_LANE = 128
_LN_EPS = 1e-6
_SQRT_2_OVER_PI = math.sqrt(2.0 / math.pi)


def _round_up(x, m):
    return (x + m - 1) // m * m


def _gelu(y):
    # tanh approximation (matches jax.nn.gelu(approximate=True)); EUP tanh.
    return 0.5 * y * (1.0 + jnp.tanh(_SQRT_2_OVER_PI * (y + 0.044715 * y * y * y)))


@functools.lru_cache(maxsize=None)
def _hw_tile_caps():
    """Generation-aware (tm_cap, tn_cap): v7x has 64 MiB VMEM -> smaller rows."""
    vmem = 128 * 1024 * 1024
    try:
        vmem = int(pltpu.get_tpu_info().vmem_capacity_bytes)
    except Exception:
        pass
    if vmem <= 64 * 1024 * 1024:        # v7x: 64 MiB VMEM per TensorCore
        return 256, 512
    return 512, 512                     # v5e / v6e: 128 MiB


def _choose_tile(n, cap, granule):
    """Largest tile <= cap that is a multiple of `granule` and divides n;
    falls back to the full dimension (a full-dim block is always legal)."""
    if n <= cap:
        return n
    t = (cap // granule) * granule
    while t >= granule:
        if n % t == 0:
            return t
        t -= granule
    return n


# -----------------------------------------------------------------------------
# Fused dense kernel:  out = [residual +] act( LN?(x) @ w + b )
# Grid = (M/tm, N/tn), full K per tile (no K loop / accumulator for ViT-B).
# Weights are pre-cast to the MXU compute dtype; x is cast in-kernel, so no
# XLA-side pad/astype passes are emitted per call.
# -----------------------------------------------------------------------------
def dense(x, w, b, *, gamma=None, beta=None, activation=None, residual=None,
          out_dtype=jnp.float32):
    M, K = x.shape
    Kw, N = w.shape
    assert K == Kw, (x.shape, w.shape)
    has_ln = gamma is not None
    has_res = residual is not None
    cdt = w.dtype                        # MXU compute dtype (set at prep time)

    tm_cap, tn_cap = _hw_tile_caps()
    tm = _choose_tile(M, tm_cap, _SUBLANE)
    tn = _choose_tile(N, tn_cap, _LANE)

    def kernel(*refs):
        it = iter(refs)
        x_ref = next(it)
        g_ref = next(it) if has_ln else None
        be_ref = next(it) if has_ln else None
        w_ref = next(it)
        b_ref = next(it)
        r_ref = next(it) if has_res else None
        o_ref = next(it)

        if has_ln:                       # fused LayerNorm on the resident tile
            xf = x_ref[...].astype(jnp.float32)
            mu = jnp.mean(xf, axis=-1, keepdims=True)
            c = xf - mu
            var = jnp.mean(c * c, axis=-1, keepdims=True)
            xf = c * lax.rsqrt(var + _LN_EPS) * g_ref[...] + be_ref[...]
            xv = xf.astype(cdt)
        else:
            xv = x_ref[...].astype(cdt)

        y = jnp.dot(xv, w_ref[...], preferred_element_type=jnp.float32)
        y = y + b_ref[...]               # f32 epilogue (v5e-safe)
        if activation == "gelu":
            y = _gelu(y)
        if has_res:
            y = y + r_ref[...].astype(jnp.float32)
        o_ref[...] = y.astype(o_ref.dtype)

    # x tile stays resident across the inner N axis; the weight block depends
    # only on j, so it is streamed once per row-tile.
    in_specs = [pl.BlockSpec((tm, K), lambda i, j: (i, 0))]
    args = [x]
    if has_ln:
        in_specs += [pl.BlockSpec((1, K), lambda i, j: (0, 0)),
                     pl.BlockSpec((1, K), lambda i, j: (0, 0))]
        args += [gamma, beta]
    in_specs += [pl.BlockSpec((K, tn), lambda i, j: (0, j)),
                 pl.BlockSpec((1, tn), lambda i, j: (0, j))]
    args += [w, b]
    if has_res:
        in_specs.append(pl.BlockSpec((tm, tn), lambda i, j: (i, j)))
        args.append(residual)

    bytes_accessed = sum(int(a.size) * a.dtype.itemsize for a in args)
    bytes_accessed += M * N * jnp.dtype(out_dtype).itemsize
    cost = pl.CostEstimate(
        flops=int(2 * M * K * N),
        transcendentals=int(M * N if activation == "gelu" else 0),
        bytes_accessed=int(bytes_accessed),
    )

    return pl.pallas_call(
        kernel,
        out_shape=jax.ShapeDtypeStruct((M, N), out_dtype),
        grid=(M // tm, N // tn),
        in_specs=in_specs,
        out_specs=pl.BlockSpec((tm, tn), lambda i, j: (i, j)),
        compiler_params=pltpu.CompilerParams(
            dimension_semantics=("parallel", "parallel"),
            vmem_limit_bytes=32 * 1024 * 1024,
        ),
        cost_estimate=cost,
    )(*args)


# -----------------------------------------------------------------------------
# Multi-head self-attention directly on the (B, Spad, 3*D) qkv layout.
# One grid step per image; all heads handled in-kernel via static column
# slices (no head-dim padding, no HBM transposes).  Padded key rows (>= S) are
# masked out of the softmax; scores stay f32 so the -1e30 mask is safe.
# -----------------------------------------------------------------------------
def mha_attention(qkv, n_heads, seq_real, *, out_dtype, approx_recip):
    B, Sp, three_d = qkv.shape
    D = three_d // 3
    Dh = D // n_heads
    scale = Dh ** -0.5

    def kernel(qkv_ref, o_ref):
        qkv_v = qkv_ref[...]
        outs = []
        for h in range(n_heads):
            q = qkv_v[:, h * Dh:(h + 1) * Dh] * scale       # fold 1/sqrt(Dh) into q
            k = qkv_v[:, D + h * Dh:D + (h + 1) * Dh]
            v = qkv_v[:, 2 * D + h * Dh:2 * D + (h + 1) * Dh]
            s = lax.dot_general(q, k, (((1,), (1,)), ((), ())),
                                preferred_element_type=jnp.float32)
            if Sp > seq_real:                               # mask padded keys
                kidx = lax.broadcasted_iota(jnp.int32, s.shape, 1)
                s = jnp.where(kidx < seq_real, s, -1e30)
            m = jnp.max(s, axis=-1, keepdims=True)
            p = jnp.exp(s - m)
            l = jnp.sum(p, axis=-1, keepdims=True)
            o = lax.dot_general(p.astype(v.dtype), v, (((1,), (0,)), ((), ())),
                                preferred_element_type=jnp.float32)
            o = o * pl.reciprocal(l, approx=approx_recip)
            outs.append(o.astype(o_ref.dtype))
        o_ref[...] = jnp.concatenate(outs, axis=-1)         # one lane-dense store

    cost = pl.CostEstimate(
        flops=int(4 * B * n_heads * Sp * Sp * Dh),
        transcendentals=int(B * n_heads * Sp * Sp),
        bytes_accessed=int(qkv.size * qkv.dtype.itemsize
                           + B * Sp * D * jnp.dtype(out_dtype).itemsize),
    )
    return pl.pallas_call(
        kernel,
        out_shape=jax.ShapeDtypeStruct((B, Sp, D), out_dtype),
        grid=(B,),
        in_specs=[pl.BlockSpec((pl.Squeezed(), Sp, three_d), lambda b: (b, 0, 0))],
        out_specs=pl.BlockSpec((pl.Squeezed(), Sp, D), lambda b: (b, 0, 0)),
        compiler_params=pltpu.CompilerParams(
            dimension_semantics=("parallel",),
            vmem_limit_bytes=32 * 1024 * 1024,
        ),
        cost_estimate=cost,
    )(qkv)


# -----------------------------------------------------------------------------
# ViT forward (NCHW image in, logits out)
# -----------------------------------------------------------------------------
def encoder_layer(x2, p, cfg, compute_dtype, B, Spad, seq_real):
    D, nH = cfg["dim"], cfg["heads"]
    # pre-norm MHSA: LN fused into the qkv matmul, residual fused into proj.
    qkv = dense(x2, p["qkv_w"], p["qkv_b"], gamma=p["ln1_g"], beta=p["ln1_b"],
                out_dtype=compute_dtype)
    attn = mha_attention(qkv.reshape(B, Spad, 3 * D), nH, seq_real,
                         out_dtype=compute_dtype,
                         approx_recip=(compute_dtype != jnp.float32))
    x2 = dense(attn.reshape(B * Spad, D), p["proj_w"], p["proj_b"],
               residual=x2, out_dtype=jnp.float32)
    # pre-norm MLP: LN + GELU fused into fc1, residual fused into fc2.
    f1 = dense(x2, p["fc1_w"], p["fc1_b"], gamma=p["ln2_g"], beta=p["ln2_b"],
               activation="gelu", out_dtype=compute_dtype)
    x2 = dense(f1, p["fc2_w"], p["fc2_b"], residual=x2, out_dtype=jnp.float32)
    return x2


def vit_forward(x_nchw, kparams, cfg, compute_dtype=jnp.float32):
    B, C, H, W = x_nchw.shape
    P, D = cfg["patch"], cfg["dim"]
    Hp, Wp = H // P, W // P
    S = Hp * Wp + 1

    # Non-overlapping PxP patch extraction is a pure reshape (no im2col
    # duplication); the patch-embed conv is a single matmul.
    patches = x_nchw.reshape(B, C, Hp, P, Wp, P).transpose(0, 2, 4, 1, 3, 5)
    patches = patches.reshape(B * Hp * Wp, C * P * P)
    tok = dense(patches, kparams["pe_w"], kparams["pe_b"], out_dtype=jnp.float32)

    cls = jnp.broadcast_to(kparams["cls"], (B, 1, D))
    x = jnp.concatenate([cls, tok.reshape(B, Hp * Wp, D)], axis=1) + kparams["pos"]

    # Pad the sequence ONCE with zeros; padded keys are masked inside
    # attention and padded rows are dropped only at the cls-row extraction.
    seq_align = _SUBLANE if S < _LANE else _LANE     # lane-dense scores at real scale
    Spad = _round_up(S, seq_align)
    if Spad != S:
        x = jnp.pad(x, ((0, 0), (0, Spad - S), (0, 0)))
    x2 = x.reshape(B * Spad, D)                      # f32 residual stream

    for lp in kparams["layers"]:
        x2 = encoder_layer(x2, lp, cfg, compute_dtype, B, Spad, S)

    # Final LayerNorm + linear head on the cls rows only (one fused call).
    cls_tok = x2.reshape(B, Spad, D)[:, 0, :]
    logits = dense(cls_tok, kparams["head_w"], kparams["head_b"],
                   gamma=kparams["lnf_g"], beta=kparams["lnf_b"],
                   out_dtype=jnp.float32)
    return logits


# -----------------------------------------------------------------------------
# One-time parameter preparation: cast matmul weights to the MXU compute dtype,
# reshape biases / LN params to (1, dim) f32 for the kernel epilogues.
# -----------------------------------------------------------------------------
def prepare_params(params, compute_dtype):
    def w(a):
        return a.astype(compute_dtype)

    def row(a):
        return a.reshape(1, -1).astype(jnp.float32)

    kp = {
        "pe_w": w(params["pe_w"]), "pe_b": row(params["pe_b"]),
        "cls": params["cls"], "pos": params["pos"],
        "lnf_g": row(params["lnf_g"]), "lnf_b": row(params["lnf_b"]),
        "head_w": w(params["head_w"]), "head_b": row(params["head_b"]),
        "layers": [],
    }
    for p in params["layers"]:
        kp["layers"].append({
            "ln1_g": row(p["ln1_g"]), "ln1_b": row(p["ln1_b"]),
            "qkv_w": w(p["qkv_w"]), "qkv_b": row(p["qkv_b"]),
            "proj_w": w(p["proj_w"]), "proj_b": row(p["proj_b"]),
            "ln2_g": row(p["ln2_g"]), "ln2_b": row(p["ln2_b"]),
            "fc1_w": w(p["fc1_w"]), "fc1_b": row(p["fc1_b"]),
            "fc2_w": w(p["fc2_w"]), "fc2_b": row(p["fc2_b"]),
        })
    return kp


# -----------------------------------------------------------------------------
# Pure-JAX reference (same math, XLA ops) for correctness checking
# -----------------------------------------------------------------------------
def vit_reference(x_nchw, params, cfg):
    B, C, H, W = x_nchw.shape
    P, D, nH = cfg["patch"], cfg["dim"], cfg["heads"]
    Hp, Wp = H // P, W // P
    Dh = D // nH

    def ln(z, g, b):
        mu = jnp.mean(z, -1, keepdims=True)
        var = jnp.mean((z - mu) ** 2, -1, keepdims=True)
        return (z - mu) / jnp.sqrt(var + _LN_EPS) * g + b

    patches = x_nchw.reshape(B, C, Hp, P, Wp, P).transpose(0, 2, 4, 1, 3, 5)
    patches = patches.reshape(B, Hp * Wp, C * P * P)
    tok = patches @ params["pe_w"] + params["pe_b"]
    cls = jnp.broadcast_to(params["cls"], (B, 1, D))
    x = jnp.concatenate([cls, tok], axis=1) + params["pos"]
    S = x.shape[1]

    for p in params["layers"]:
        h = ln(x, p["ln1_g"], p["ln1_b"])
        qkv = (h @ p["qkv_w"] + p["qkv_b"]).reshape(B, S, 3, nH, Dh)
        qkv = qkv.transpose(2, 0, 3, 1, 4)
        q, k, v = qkv[0], qkv[1], qkv[2]
        s = jnp.einsum("bhqd,bhkd->bhqk", q, k) * (Dh ** -0.5)
        a = jax.nn.softmax(s, axis=-1)
        o = jnp.einsum("bhqk,bhkd->bhqd", a, v)
        o = o.transpose(0, 2, 1, 3).reshape(B, S, D)
        x = x + (o @ p["proj_w"] + p["proj_b"])
        h2 = ln(x, p["ln2_g"], p["ln2_b"])
        f = jax.nn.gelu(h2 @ p["fc1_w"] + p["fc1_b"], approximate=True)
        x = x + (f @ p["fc2_w"] + p["fc2_b"])

    x = ln(x, params["lnf_g"], params["lnf_b"])
    return x[:, 0] @ params["head_w"] + params["head_b"]


# -----------------------------------------------------------------------------
def init_vit_params(key, cfg):
    D, F, C, P = cfg["dim"], cfg["mlp"], cfg["in_ch"], cfg["patch"]
    L, NC = cfg["layers"], cfg["classes"]
    n_tok = (cfg["img"] // P) ** 2 + 1
    keys = iter(jax.random.split(key, 8 + 16 * L))

    def dense_w(k, fan_in, fan_out):
        return (fan_in ** -0.5) * jax.random.normal(k, (fan_in, fan_out), jnp.float32)

    def vec(k, n, scale=0.01):
        return scale * jax.random.normal(k, (n,), jnp.float32)

    params = {
        "pe_w": dense_w(next(keys), C * P * P, D),
        "pe_b": vec(next(keys), D),
        "cls": 0.02 * jax.random.normal(next(keys), (1, 1, D), jnp.float32),
        "pos": 0.02 * jax.random.normal(next(keys), (1, n_tok, D), jnp.float32),
        "lnf_g": 1.0 + vec(next(keys), D, 0.05),
        "lnf_b": vec(next(keys), D, 0.05),
        "head_w": dense_w(next(keys), D, NC),
        "head_b": vec(next(keys), NC),
        "layers": [],
    }
    for _ in range(L):
        params["layers"].append({
            "ln1_g": 1.0 + vec(next(keys), D, 0.05),
            "ln1_b": vec(next(keys), D, 0.05),
            "qkv_w": dense_w(next(keys), D, 3 * D),
            "qkv_b": vec(next(keys), 3 * D),
            "proj_w": dense_w(next(keys), D, D),
            "proj_b": vec(next(keys), D),
            "ln2_g": 1.0 + vec(next(keys), D, 0.05),
            "ln2_b": vec(next(keys), D, 0.05),
            "fc1_w": dense_w(next(keys), D, F),
            "fc1_b": vec(next(keys), F),
            "fc2_w": dense_w(next(keys), F, D),
            "fc2_b": vec(next(keys), D),
        })
    return params


if __name__ == "__main__":
    # Toy config consistent with the module structure (ViT-B/16 style).
    cfg = dict(img=32, patch=16, in_ch=3, dim=32, heads=4, mlp=128,
               layers=2, classes=10)
    key = jax.random.PRNGKey(0)
    kx, kp = jax.random.split(key)
    x = jax.random.normal(kx, (2, cfg["in_ch"], cfg["img"], cfg["img"]), jnp.float32)
    params = init_vit_params(kp, cfg)

    # f32 MXU-input path + correctness check against the XLA reference.
    kp_f32 = prepare_params(params, jnp.float32)
    fwd_f32 = jax.jit(functools.partial(vit_forward, cfg=cfg,
                                        compute_dtype=jnp.float32))
    logits = jax.block_until_ready(fwd_f32(x, kp_f32))
    assert logits.shape == (2, cfg["classes"]), logits.shape

    with jax.default_matmul_precision("float32"):
        ref = jax.block_until_ready(vit_reference(x, params, cfg))
    err = float(jnp.max(jnp.abs(logits - ref)))
    assert jnp.allclose(logits, ref, atol=2e-3, rtol=2e-3), err

    # bf16 MXU-input / f32-accumulate path (recommended default on v6e/v7x):
    # weights pre-cast once; intermediates emitted in bf16; residual stream f32.
    kp_bf16 = prepare_params(params, jnp.bfloat16)
    fwd_bf16 = jax.jit(functools.partial(vit_forward, cfg=cfg,
                                         compute_dtype=jnp.bfloat16))
    logits_bf16 = jax.block_until_ready(fwd_bf16(x, kp_bf16))
    assert logits_bf16.shape == (2, cfg["classes"]), logits_bf16.shape
    assert bool(jnp.all(jnp.isfinite(logits_bf16)))

    print("KERNEL_OK")
</pallas_src>

<mosaic_0001>
module attributes {stable_mosaic.version = 11 : i64} {
  func.func @kernel(%arg0: i32, %arg1: i32, %arg2: memref<8x768xf32, #tpu.memory_space<vmem>>, %arg3: memref<768x32xf32, #tpu.memory_space<vmem>>, %arg4: memref<1x32xf32, #tpu.memory_space<vmem>>, %arg5: memref<8x32xf32, #tpu.memory_space<vmem>>) attributes {dimension_semantics = [#tpu.dimension_semantics<parallel>, #tpu.dimension_semantics<parallel>], iteration_bounds = array<i64: 1, 1>, scalar_prefetch = 0 : i64, scratch_operands = 0 : i64, tpu.core_type = #tpu.core_type<tc>, window_params = [{transform_indices = @transform_0, window_bounds = array<i64: 8, 768>}, {transform_indices = @transform_1, window_bounds = array<i64: 768, 32>}, {transform_indices = @transform_2, window_bounds = array<i64: 1, 32>}, {transform_indices = @transform_3, window_bounds = array<i64: 8, 32>}]} {
    %c0 = arith.constant 0 : index
    %c0_0 = arith.constant 0 : index
    %0 = vector.load %arg2[%c0, %c0_0] : memref<8x768xf32, #tpu.memory_space<vmem>>, vector<8x768xf32>
    %c0_1 = arith.constant 0 : index
    %c0_2 = arith.constant 0 : index
    %1 = vector.load %arg3[%c0_1, %c0_2] : memref<768x32xf32, #tpu.memory_space<vmem>>, vector<768x32xf32>
    %cst = arith.constant dense<0.000000e+00> : vector<8x32xf32>
    %2 = tpu.matmul %0, %1, %cst {dimension_numbers = #tpu.dot_dimension_numbers<[1], [0], [0], [1], [0, 0, 1, 1], [], []>} : vector<8x768xf32>, vector<768x32xf32>, vector<8x32xf32> -> vector<8x32xf32>
    %c0_3 = arith.constant 0 : index
    %c0_4 = arith.constant 0 : index
    %3 = vector.load %arg4[%c0_3, %c0_4] : memref<1x32xf32, #tpu.memory_space<vmem>>, vector<1x32xf32>
    %4 = vector.broadcast %3 : vector<1x32xf32> to vector<8x32xf32>
    %5 = arith.addf %2, %4 : vector<8x32xf32>
    %c0_5 = arith.constant 0 : index
    %c0_6 = arith.constant 0 : index
    %6 = vector.load %arg5[%c0_5, %c0_6] : memref<8x32xf32, #tpu.memory_space<vmem>>, vector<8x32xf32>
    tpu.vector_store %arg5[%c0_5, %c0_6], %5 {strides = array<i32>} : memref<8x32xf32, #tpu.memory_space<vmem>>, vector<8x32xf32>,
    return
  }
  func.func @transform_0(%arg0: i32, %arg1: i32) -> (i32, i32) {
    %c0_i32 = arith.constant 0 : i32
    %c0_i32_0 = arith.constant 0 : i32
    return %arg0, %c0_i32 : i32, i32
  }
  func.func @transform_1(%arg0: i32, %arg1: i32) -> (i32, i32) {
    %c0_i32 = arith.constant 0 : i32
    %c0_i32_0 = arith.constant 0 : i32
    return %c0_i32, %arg1 : i32, i32
  }
  func.func @transform_2(%arg0: i32, %arg1: i32) -> (i32, i32) {
    %c0_i32 = arith.constant 0 : i32
    %c0_i32_0 = arith.constant 0 : i32
    return %c0_i32, %arg1 : i32, i32
  }
  func.func @transform_3(%arg0: i32, %arg1: i32) -> (i32, i32) {
    %c0_i32 = arith.constant 0 : i32
    return %arg0, %arg1 : i32, i32
  }
}

module attributes {stable_mosaic.version = 11 : i64} {
  func.func @kernel(%arg0: i32, %arg1: i32, %arg2: memref<16x32xf32, #tpu.memory_space<vmem>>, %arg3: memref<1x32xf32, #tpu.memory_space<vmem>>, %arg4: memref<1x32xf32, #tpu.memory_space<vmem>>, %arg5: memref<32x96xf32, #tpu.memory_space<vmem>>, %arg6: memref<1x96xf32, #tpu.memory_space<vmem>>, %arg7: memref<16x96xf32, #tpu.memory_space<vmem>>) attributes {dimension_semantics = [#tpu.dimension_semantics<parallel>, #tpu.dimension_semantics<parallel>], iteration_bounds = array<i64: 1, 1>, scalar_prefetch = 0 : i64, scratch_operands = 0 : i64, tpu.core_type = #tpu.core_type<tc>, window_params = [{transform_indices = @transform_0, window_bounds = array<i64: 16, 32>}, {pipeline_mode = #tpu.pipeline_mode<synchronous>, transform_indices = @transform_1, window_bounds = array<i64: 1, 32>}, {pipeline_mode = #tpu.pipeline_mode<synchronous>, transform_indices = @transform_2, window_bounds = array<i64: 1, 32>}, {transform_indices = @transform_3, window_bounds = array<i64: 32, 96>}, {transform_indices = @transform_4, window_bounds = array<i64: 1, 96>}, {transform_indices = @transform_5, window_bounds = array<i64: 16, 96>}]} {
    %c0 = arith.constant 0 : index
    %c0_0 = arith.constant 0 : index
    %0 = vector.load %arg2[%c0, %c0_0] : memref<16x32xf32, #tpu.memory_space<vmem>>, vector<16x32xf32>
    %cst = arith.constant dense<0.000000e+00> : vector<16xf32>
    %1 = vector.multi_reduction <add>, %0, %cst [1] : vector<16x32xf32> to vector<16xf32>
    %2 = vector.shape_cast %1 : vector<16xf32> to vector<16x1xf32>
    %cst_1 = arith.constant 3.200000e+01 : f32
    %3 = vector.broadcast %cst_1 : f32 to vector<16x1xf32>
    %4 = arith.divf %2, %3 : vector<16x1xf32>
    %5 = vector.broadcast %4 : vector<16x1xf32> to vector<16x32xf32>
    %6 = arith.subf %0, %5 : vector<16x32xf32>
    %7 = arith.mulf %6, %6 : vector<16x32xf32>
    %cst_2 = arith.constant dense<0.000000e+00> : vector<16xf32>
    %8 = vector.multi_reduction <add>, %7, %cst_2 [1] : vector<16x32xf32> to vector<16xf32>
    %9 = vector.shape_cast %8 : vector<16xf32> to vector<16x1xf32>
    %cst_3 = arith.constant 3.200000e+01 : f32
    %10 = vector.broadcast %cst_3 : f32 to vector<16x1xf32>
    %11 = arith.divf %9, %10 : vector<16x1xf32>
    %cst_4 = arith.constant 9.99999997E-7 : f32
    %12 = vector.broadcast %cst_4 : f32 to vector<16x1xf32>
    %13 = arith.addf %11, %12 : vector<16x1xf32>
    %14 = math.rsqrt %13 : vector<16x1xf32>
    %15 = vector.broadcast %14 : vector<16x1xf32> to vector<16x32xf32>
    %16 = arith.mulf %6, %15 : vector<16x32xf32>
    %c0_5 = arith.constant 0 : index
    %c0_6 = arith.constant 0 : index
    %17 = vector.load %arg3[%c0_5, %c0_6] : memref<1x32xf32, #tpu.memory_space<vmem>>, vector<1x32xf32>
    %18 = vector.broadcast %17 : vector<1x32xf32> to vector<16x32xf32>
    %19 = arith.mulf %16, %18 : vector<16x32xf32>
    %c0_7 = arith.constant 0 : index
    %c0_8 = arith.constant 0 : index
    %20 = vector.load %arg4[%c0_7, %c0_8] : memref<1x32xf32, #tpu.memory_space<vmem>>, vector<1x32xf32>
    %21 = vector.broadcast %20 : vector<1x32xf32> to vector<16x32xf32>
    %22 = arith.addf %19, %21 : vector<16x32xf32>
    %c0_9 = arith.constant 0 : index
    %c0_10 = arith.constant 0 : index
    %23 = vector.load %arg5[%c0_9, %c0_10] : memref<32x96xf32, #tpu.memory_space<vmem>>, vector<32x96xf32>
    %cst_11 = arith.constant dense<0.000000e+00> : vector<16x96xf32>
    %24 = tpu.matmul %22, %23, %cst_11 {dimension_numbers = #tpu.dot_dimension_numbers<[1], [0], [0], [1], [0, 0, 1, 1], [], []>} : vector<16x32xf32>, vector<32x96xf32>, vector<16x96xf32> -> vector<16x96xf32>
    %c0_12 = arith.constant 0 : index
    %c0_13 = arith.constant 0 : index
    %25 = vector.load %arg6[%c0_12, %c0_13] : memref<1x96xf32, #tpu.memory_space<vmem>>, vector<1x96xf32>
    %26 = vector.broadcast %25 : vector<1x96xf32> to vector<16x96xf32>
    %27 = arith.addf %24, %26 : vector<16x96xf32>
    %c0_14 = arith.constant 0 : index
    %c0_15 = arith.constant 0 : index
    %28 = vector.load %arg7[%c0_14, %c0_15] : memref<16x96xf32, #tpu.memory_space<vmem>>, vector<16x96xf32>
    tpu.vector_store %arg7[%c0_14, %c0_15], %27 {strides = array<i32>} : memref<16x96xf32, #tpu.memory_space<vmem>>, vector<16x96xf32>,
    return
  }
  func.func @transform_0(%arg0: i32, %arg1: i32) -> (i32, i32) {
    %c0_i32 = arith.constant 0 : i32
    %c0_i32_0 = arith.constant 0 : i32
    return %arg0, %c0_i32 : i32, i32
  }
  func.func @transform_1(%arg0: i32, %arg1: i32) -> (i32, i32) {
    %c0_i32 = arith.constant 0 : i32
    %c0_i32_0 = arith.constant 0 : i32
    %c0_i32_1 = arith.constant 0 : i32
    return %c0_i32, %c0_i32_0 : i32, i32
  }
  func.func @transform_2(%arg0: i32, %arg1: i32) -> (i32, i32) {
    %c0_i32 = arith.constant 0 : i32
    %c0_i32_0 = arith.constant 0 : i32
    %c0_i32_1 = arith.constant 0 : i32
    return %c0_i32, %c0_i32_0 : i32, i32
  }
  func.func @transform_3(%arg0: i32, %arg1: i32) -> (i32, i32) {
    %c0_i32 = arith.constant 0 : i32
    %c0_i32_0 = arith.constant 0 : i32
    return %c0_i32, %arg1 : i32, i32
  }
  func.func @transform_4(%arg0: i32, %arg1: i32) -> (i32, i32) {
    %c0_i32 = arith.constant 0 : i32
    %c0_i32_0 = arith.constant 0 : i32
    return %c0_i32, %arg1 : i32, i32
  }
  func.func @transform_5(%arg0: i32, %arg1: i32) -> (i32, i32) {
    %c0_i32 = arith.constant 0 : i32
    return %arg0, %arg1 : i32, i32
  }
}

module attributes {stable_mosaic.version = 11 : i64} {
  func.func @kernel(%arg0: i32, %arg1: i32, %arg2: memref<16x32xf32, #tpu.memory_space<vmem>>, %arg3: memref<32x32xf32, #tpu.memory_space<vmem>>, %arg4: memref<1x32xf32, #tpu.memory_space<vmem>>, %arg5: memref<16x32xf32, #tpu.memory_space<vmem>>, %arg6: memref<16x32xf32, #tpu.memory_space<vmem>>) attributes {dimension_semantics = [#tpu.dimension_semantics<parallel>, #tpu.dimension_semantics<parallel>], iteration_bounds = array<i64: 1, 1>, scalar_prefetch = 0 : i64, scratch_operands = 0 : i64, tpu.core_type = #tpu.core_type<tc>, window_params = [{transform_indices = @transform_0, window_bounds = array<i64: 16, 32>}, {transform_indices = @transform_1, window_bounds = array<i64: 32, 32>}, {transform_indices = @transform_2, window_bounds = array<i64: 1, 32>}, {transform_indices = @transform_3, window_bounds = array<i64: 16, 32>}, {transform_indices = @transform_4, window_bounds = array<i64: 16, 32>}]} {
    %c0 = arith.constant 0 : index
    %c0_0 = arith.constant 0 : index
    %0 = vector.load %arg2[%c0, %c0_0] : memref<16x32xf32, #tpu.memory_space<vmem>>, vector<16x32xf32>
    %c0_1 = arith.constant 0 : index
    %c0_2 = arith.constant 0 : index
    %1 = vector.load %arg3[%c0_1, %c0_2] : memref<32x32xf32, #tpu.memory_space<vmem>>, vector<32x32xf32>
    %cst = arith.constant dense<0.000000e+00> : vector<16x32xf32>
    %2 = tpu.matmul %0, %1, %cst {dimension_numbers = #tpu.dot_dimension_numbers<[1], [0], [0], [1], [0, 0, 1, 1], [], []>} : vector<16x32xf32>, vector<32x32xf32>, vector<16x32xf32> -> vector<16x32xf32>
    %c0_3 = arith.constant 0 : index
    %c0_4 = arith.constant 0 : index
    %3 = vector.load %arg4[%c0_3, %c0_4] : memref<1x32xf32, #tpu.memory_space<vmem>>, vector<1x32xf32>
    %4 = vector.broadcast %3 : vector<1x32xf32> to vector<16x32xf32>
    %5 = arith.addf %2, %4 : vector<16x32xf32>
    %c0_5 = arith.constant 0 : index
    %c0_6 = arith.constant 0 : index
    %6 = vector.load %arg5[%c0_5, %c0_6] : memref<16x32xf32, #tpu.memory_space<vmem>>, vector<16x32xf32>
    %7 = arith.addf %5, %6 : vector<16x32xf32>
    %c0_7 = arith.constant 0 : index
    %c0_8 = arith.constant 0 : index
    %8 = vector.load %arg6[%c0_7, %c0_8] : memref<16x32xf32, #tpu.memory_space<vmem>>, vector<16x32xf32>
    tpu.vector_store %arg6[%c0_7, %c0_8], %7 {strides = array<i32>} : memref<16x32xf32, #tpu.memory_space<vmem>>, vector<16x32xf32>,
    return
  }
  func.func @transform_0(%arg0: i32, %arg1: i32) -> (i32, i32) {
    %c0_i32 = arith.constant 0 : i32
    %c0_i32_0 = arith.constant 0 : i32
    return %arg0, %c0_i32 : i32, i32
  }
  func.func @transform_1(%arg0: i32, %arg1: i32) -> (i32, i32) {
    %c0_i32 = arith.constant 0 : i32
    %c0_i32_0 = arith.constant 0 : i32
    return %c0_i32, %arg1 : i32, i32
  }
  func.func @transform_2(%arg0: i32, %arg1: i32) -> (i32, i32) {
    %c0_i32 = arith.constant 0 : i32
    %c0_i32_0 = arith.constant 0 : i32
    return %c0_i32, %arg1 : i32, i32
  }
  func.func @transform_3(%arg0: i32, %arg1: i32) -> (i32, i32) {
    %c0_i32 = arith.constant 0 : i32
    return %arg0, %arg1 : i32, i32
  }
  func.func @transform_4(%arg0: i32, %arg1: i32) -> (i32, i32) {
    %c0_i32 = arith.constant 0 : i32
    return %arg0, %arg1 : i32, i32
  }
}

module attributes {stable_mosaic.version = 11 : i64} {
  func.func @kernel(%arg0: i32, %arg1: memref<1x8x96xf32, #tpu.memory_space<vmem>>, %arg2: memref<1x8x32xf32, #tpu.memory_space<vmem>>) attributes {dimension_semantics = [#tpu.dimension_semantics<parallel>], iteration_bounds = array<i64: 2>, scalar_prefetch = 0 : i64, scratch_operands = 0 : i64, tpu.core_type = #tpu.core_type<tc>, window_params = [{transform_indices = @transform_0, window_bounds = array<i64: 1, 8, 96>}, {transform_indices = @transform_1, window_bounds = array<i64: 1, 8, 32>}]} {
    %c0 = arith.constant 0 : index
    %c0_0 = arith.constant 0 : index
    %c0_1 = arith.constant 0 : index
    %0 = vector.load %arg1[%c0, %c0_0, %c0_1] : memref<1x8x96xf32, #tpu.memory_space<vmem>>, vector<1x8x96xf32>
    %1 = vector.shape_cast %0 : vector<1x8x96xf32> to vector<8x96xf32>
    %2 = vector.extract_strided_slice %1 {offsets = [0, 0], sizes = [8, 8], strides = [1, 1]} : vector<8x96xf32> to vector<8x8xf32>
    %cst = arith.constant 0.353553385 : f32
    %3 = vector.broadcast %cst : f32 to vector<8x8xf32>
    %4 = arith.mulf %2, %3 : vector<8x8xf32>
    %5 = vector.extract_strided_slice %1 {offsets = [0, 32], sizes = [8, 8], strides = [1, 1]} : vector<8x96xf32> to vector<8x8xf32>
    %6 = vector.extract_strided_slice %1 {offsets = [0, 64], sizes = [8, 8], strides = [1, 1]} : vector<8x96xf32> to vector<8x8xf32>
    %cst_2 = arith.constant dense<0.000000e+00> : vector<8x8xf32>
    %7 = tpu.matmul %4, %5, %cst_2 {dimension_numbers = #tpu.dot_dimension_numbers<[1], [1], [0], [0], [0, 0, 1, 0], [], []>} : vector<8x8xf32>, vector<8x8xf32>, vector<8x8xf32> -> vector<8x8xf32>
    %8 = tpu.iota {dimensions = array<i32: 1>} : vector<8x8xi32>
    %c5_i32 = arith.constant 5 : i32
    %9 = vector.broadcast %c5_i32 : i32 to vector<8x8xi32>
    %10 = arith.cmpi slt, %8, %9 : vector<8x8xi32>
    %cst_3 = arith.constant -1.000000e+30 : f32
    %11 = vector.broadcast %cst_3 : f32 to vector<8x8xf32>
    %12 = arith.select %10, %7, %11 : vector<8x8xi1>, vector<8x8xf32>
    %cst_4 = arith.constant dense<0xFF800000> : vector<8xf32>
    %13 = vector.multi_reduction <maximumf>, %12, %cst_4 [1] : vector<8x8xf32> to vector<8xf32>
    %14 = vector.shape_cast %13 : vector<8xf32> to vector<8x1xf32>
    %15 = vector.broadcast %14 : vector<8x1xf32> to vector<8x8xf32>
    %16 = arith.subf %12, %15 : vector<8x8xf32>
    %17 = math.exp %16 : vector<8x8xf32>
    %cst_5 = arith.constant dense<0.000000e+00> : vector<8xf32>
    %18 = vector.multi_reduction <add>, %17, %cst_5 [1] : vector<8x8xf32> to vector<8xf32>
    %19 = vector.shape_cast %18 : vector<8xf32> to vector<8x1xf32>
    %cst_6 = arith.constant dense<0.000000e+00> : vector<8x8xf32>
    %20 = tpu.matmul %17, %6, %cst_6 {dimension_numbers = #tpu.dot_dimension_numbers<[1], [0], [0], [1], [0, 0, 1, 1], [], []>} : vector<8x8xf32>, vector<8x8xf32>, vector<8x8xf32> -> vector<8x8xf32>
    %21 = tpu.reciprocal %19 : vector<8x1xf32> -> vector<8x1xf32>
    %22 = vector.broadcast %21 : vector<8x1xf32> to vector<8x8xf32>
    %23 = arith.mulf %20, %22 : vector<8x8xf32>
    %24 = vector.extract_strided_slice %1 {offsets = [0, 8], sizes = [8, 8], strides = [1, 1]} : vector<8x96xf32> to vector<8x8xf32>
    %cst_7 = arith.constant 0.353553385 : f32
    %25 = vector.broadcast %cst_7 : f32 to vector<8x8xf32>
    %26 = arith.mulf %24, %25 : vector<8x8xf32>
    %27 = vector.extract_strided_slice %1 {offsets = [0, 40], sizes = [8, 8], strides = [1, 1]} : vector<8x96xf32> to vector<8x8xf32>
    %28 = vector.extract_strided_slice %1 {offsets = [0, 72], sizes = [8, 8], strides = [1, 1]} : vector<8x96xf32> to vector<8x8xf32>
    %cst_8 = arith.constant dense<0.000000e+00> : vector<8x8xf32>
    %29 = tpu.matmul %26, %27, %cst_8 {dimension_numbers = #tpu.dot_dimension_numbers<[1], [1], [0], [0], [0, 0, 1, 0], [], []>} : vector<8x8xf32>, vector<8x8xf32>, vector<8x8xf32> -> vector<8x8xf32>
    %30 = tpu.iota {dimensions = array<i32: 1>} : vector<8x8xi32>
    %c5_i32_9 = arith.constant 5 : i32
    %31 = vector.broadcast %c5_i32_9 : i32 to vector<8x8xi32>
    %32 = arith.cmpi slt, %30, %31 : vector<8x8xi32>
    %cst_10 = arith.constant -1.000000e+30 : f32
    %33 = vector.broadcast %cst_10 : f32 to vector<8x8xf32>
    %34 = arith.select %32, %29, %33 : vector<8x8xi1>, vector<8x8xf32>
    %cst_11 = arith.constant dense<0xFF800000> : vector<8xf32>
    %35 = vector.multi_reduction <maximumf>, %34, %cst_11 [1] : vector<8x8xf32> to vector<8xf32>
    %36 = vector.shape_cast %35 : vector<8xf32> to vector<8x1xf32>
    %37 = vector.broadcast %36 : vector<8x1xf32> to vector<8x8xf32>
    %38 = arith.subf %34, %37 : vector<8x8xf32>
    %39 = math.exp %38 : vector<8x8xf32>
    %cst_12 = arith.constant dense<0.000000e+00> : vector<8xf32>
    %40 = vector.multi_reduction <add>, %39, %cst_12 [1] : vector<8x8xf32> to vector<8xf32>
    %41 = vector.shape_cast %40 : vector<8xf32> to vector<8x1xf32>
    %cst_13 = arith.constant dense<0.000000e+00> : vector<8x8xf32>
    %42 = tpu.matmul %39, %28, %cst_13 {dimension_numbers = #tpu.dot_dimension_numbers<[1], [0], [0], [1], [0, 0, 1, 1], [], []>} : vector<8x8xf32>, vector<8x8xf32>, vector<8x8xf32> -> vector<8x8xf32>
    %43 = tpu.reciprocal %41 : vector<8x1xf32> -> vector<8x1xf32>
    %44 = vector.broadcast %43 : vector<8x1xf32> to vector<8x8xf32>
    %45 = arith.mulf %42, %44 : vector<8x8xf32>
    %46 = vector.extract_strided_slice %1 {offsets = [0, 16], sizes = [8, 8], strides = [1, 1]} : vector<8x96xf32> to vector<8x8xf32>
    %cst_14 = arith.constant 0.353553385 : f32
    %47 = vector.broadcast %cst_14 : f32 to vector<8x8xf32>
    %48 = arith.mulf %46, %47 : vector<8x8xf32>
    %49 = vector.extract_strided_slice %1 {offsets = [0, 48], sizes = [8, 8], strides = [1, 1]} : vector<8x96xf32> to vector<8x8xf32>
    %50 = vector.extract_strided_slice %1 {offsets = [0, 80], sizes = [8, 8], strides = [1, 1]} : vector<8x96xf32> to vector<8x8xf32>
    %cst_15 = arith.constant dense<0.000000e+00> : vector<8x8xf32>
    %51 = tpu.matmul %48, %49, %cst_15 {dimension_numbers = #tpu.dot_dimension_numbers<[1], [1], [0], [0], [0, 0, 1, 0], [], []>} : vector<8x8xf32>, vector<8x8xf32>, vector<8x8xf32> -> vector<8x8xf32>
    %52 = tpu.iota {dimensions = array<i32: 1>} : vector<8x8xi32>
    %c5_i32_16 = arith.constant 5 : i32
    %53 = vector.broadcast %c5_i32_16 : i32 to vector<8x8xi32>
    %54 = arith.cmpi slt, %52, %53 : vector<8x8xi32>
    %cst_17 = arith.constant -1.000000e+30 : f32
    %55 = vector.broadcast %cst_17 : f32 to vector<8x8xf32>
    %56 = arith.select %54, %51, %55 : vector<8x8xi1>, vector<8x8xf32>
    %cst_18 = arith.constant dense<0xFF800000> : vector<8xf32>
    %57 = vector.multi_reduction <maximumf>, %56, %cst_18 [1] : vector<8x8xf32> to vector<8xf32>
    %58 = vector.shape_cast %57 : vector<8xf32> to vector<8x1xf32>
    %59 = vector.broadcast %58 : vector<8x1xf32> to vector<8x8xf32>
    %60 = arith.subf %56, %59 : vector<8x8xf32>
    %61 = math.exp %60 : vector<8x8xf32>
    %cst_19 = arith.constant dense<0.000000e+00> : vector<8xf32>
    %62 = vector.multi_reduction <add>, %61, %cst_19 [1] : vector<8x8xf32> to vector<8xf32>
    %63 = vector.shape_cast %62 : vector<8xf32> to vector<8x1xf32>
    %cst_20 = arith.constant dense<0.000000e+00> : vector<8x8xf32>
    %64 = tpu.matmul %61, %50, %cst_20 {dimension_numbers = #tpu.dot_dimension_numbers<[1], [0], [0], [1], [0, 0, 1, 1], [], []>} : vector<8x8xf32>, vector<8x8xf32>, vector<8x8xf32> -> vector<8x8xf32>
    %65 = tpu.reciprocal %63 : vector<8x1xf32> -> vector<8x1xf32>
    %66 = vector.broadcast %65 : vector<8x1xf32> to vector<8x8xf32>
    %67 = arith.mulf %64, %66 : vector<8x8xf32>
    %68 = vector.extract_strided_slice %1 {offsets = [0, 24], sizes = [8, 8], strides = [1, 1]} : vector<8x96xf32> to vector<8x8xf32>
    %cst_21 = arith.constant 0.353553385 : f32
    %69 = vector.broadcast %cst_21 : f32 to vector<8x8xf32>
    %70 = arith.mulf %68, %69 : vector<8x8xf32>
    %71 = vector.extract_strided_slice %1 {offsets = [0, 56], sizes = [8, 8], strides = [1, 1]} : vector<8x96xf32> to vector<8x8xf32>
    %72 = vector.extract_strided_slice %1 {offsets = [0, 88], sizes = [8, 8], strides = [1, 1]} : vector<8x96xf32> to vector<8x8xf32>
    %cst_22 = arith.constant dense<0.000000e+00> : vector<8x8xf32>
    %73 = tpu.matmul %70, %71, %cst_22 {dimension_numbers = #tpu.dot_dimension_numbers<[1], [1], [0], [0], [0, 0, 1, 0], [], []>} : vector<8x8xf32>, vector<8x8xf32>, vector<8x8xf32> -> vector<8x8xf32>
    %74 = tpu.iota {dimensions = array<i32: 1>} : vector<8x8xi32>
    %c5_i32_23 = arith.constant 5 : i32
    %75 = vector.broadcast %c5_i32_23 : i32 to vector<8x8xi32>
    %76 = arith.cmpi slt, %74, %75 : vector<8x8xi32>
    %cst_24 = arith.constant -1.000000e+30 : f32
    %77 = vector.broadcast %cst_24 : f32 to vector<8x8xf32>
    %78 = arith.select %76, %73, %77 : vector<8x8xi1>, vector<8x8xf32>
    %cst_25 = arith.constant dense<0xFF800000> : vector<8xf32>
    %79 = vector.multi_reduction <maximumf>, %78, %cst_25 [1] : vector<8x8xf32> to vector<8xf32>
    %80 = vector.shape_cast %79 : vector<8xf32> to vector<8x1xf32>
    %81 = vector.broadcast %80 : vector<8x1xf32> to vector<8x8xf32>
    %82 = arith.subf %78, %81 : vector<8x8xf32>
    %83 = math.exp %82 : vector<8x8xf32>
    %cst_26 = arith.constant dense<0.000000e+00> : vector<8xf32>
    %84 = vector.multi_reduction <add>, %83, %cst_26 [1] : vector<8x8xf32> to vector<8xf32>
    %85 = vector.shape_cast %84 : vector<8xf32> to vector<8x1xf32>
    %cst_27 = arith.constant dense<0.000000e+00> : vector<8x8xf32>
    %86 = tpu.matmul %83, %72, %cst_27 {dimension_numbers = #tpu.dot_dimension_numbers<[1], [0], [0], [1], [0, 0, 1, 1], [], []>} : vector<8x8xf32>, vector<8x8xf32>, vector<8x8xf32> -> vector<8x8xf32>
    %87 = tpu.reciprocal %85 : vector<8x1xf32> -> vector<8x1xf32>
    %88 = vector.broadcast %87 : vector<8x1xf32> to vector<8x8xf32>
    %89 = arith.mulf %86, %88 : vector<8x8xf32>
    %90 = tpu.concatenate %23, %45, %67, %89 in 1 : vector<8x8xf32>, vector<8x8xf32>, vector<8x8xf32>, vector<8x8xf32> -> vector<8x32xf32>
    %c0_28 = arith.constant 0 : index
    %c0_29 = arith.constant 0 : index
    %c0_30 = arith.constant 0 : index
    %91 = vector.load %arg2[%c0_28, %c0_29, %c0_30] : memref<1x8x32xf32, #tpu.memory_space<vmem>>, vector<1x8x32xf32>
    %92 = vector.shape_cast %91 : vector<1x8x32xf32> to vector<8x32xf32>
    %93 = vector.shape_cast %90 : vector<8x32xf32> to vector<1x8x32xf32>
    tpu.vector_store %arg2[%c0_28, %c0_29, %c0_30], %93 {strides = array<i32>} : memref<1x8x32xf32, #tpu.memory_space<vmem>>, vector<1x8x32xf32>,
    return
  }
  func.func @transform_0(%arg0: i32) -> (i32, i32, i32) {
    %c0_i32 = arith.constant 0 : i32
    %c0_i32_0 = arith.constant 0 : i32
    %c0_i32_1 = arith.constant 0 : i32
    return %arg0, %c0_i32, %c0_i32_0 : i32, i32, i32
  }
  func.func @transform_1(%arg0: i32) -> (i32, i32, i32) {
    %c0_i32 = arith.constant 0 : i32
    %c0_i32_0 = arith.constant 0 : i32
    %c0_i32_1 = arith.constant 0 : i32
    return %arg0, %c0_i32, %c0_i32_0 : i32, i32, i32
  }
}

module attributes {stable_mosaic.version = 11 : i64} {
  func.func @kernel(%arg0: i32, %arg1: i32, %arg2: memref<16x32xf32, #tpu.memory_space<vmem>>, %arg3: memref<1x32xf32, #tpu.memory_space<vmem>>, %arg4: memref<1x32xf32, #tpu.memory_space<vmem>>, %arg5: memref<32x128xf32, #tpu.memory_space<vmem>>, %arg6: memref<1x128xf32, #tpu.memory_space<vmem>>, %arg7: memref<16x128xf32, #tpu.memory_space<vmem>>) attributes {dimension_semantics = [#tpu.dimension_semantics<parallel>, #tpu.dimension_semantics<parallel>], iteration_bounds = array<i64: 1, 1>, scalar_prefetch = 0 : i64, scratch_operands = 0 : i64, tpu.core_type = #tpu.core_type<tc>, window_params = [{transform_indices = @transform_0, window_bounds = array<i64: 16, 32>}, {pipeline_mode = #tpu.pipeline_mode<synchronous>, transform_indices = @transform_1, window_bounds = array<i64: 1, 32>}, {pipeline_mode = #tpu.pipeline_mode<synchronous>, transform_indices = @transform_2, window_bounds = array<i64: 1, 32>}, {transform_indices = @transform_3, window_bounds = array<i64: 32, 128>}, {transform_indices = @transform_4, window_bounds = array<i64: 1, 128>}, {transform_indices = @transform_5, window_bounds = array<i64: 16, 128>}]} {
    %c0 = arith.constant 0 : index
    %c0_0 = arith.constant 0 : index
    %0 = vector.load %arg2[%c0, %c0_0] : memref<16x32xf32, #tpu.memory_space<vmem>>, vector<16x32xf32>
    %cst = arith.constant dense<0.000000e+00> : vector<16xf32>
    %1 = vector.multi_reduction <add>, %0, %cst [1] : vector<16x32xf32> to vector<16xf32>
    %2 = vector.shape_cast %1 : vector<16xf32> to vector<16x1xf32>
    %cst_1 = arith.constant 3.200000e+01 : f32
    %3 = vector.broadcast %cst_1 : f32 to vector<16x1xf32>
    %4 = arith.divf %2, %3 : vector<16x1xf32>
    %5 = vector.broadcast %4 : vector<16x1xf32> to vector<16x32xf32>
    %6 = arith.subf %0, %5 : vector<16x32xf32>
    %7 = arith.mulf %6, %6 : vector<16x32xf32>
    %cst_2 = arith.constant dense<0.000000e+00> : vector<16xf32>
    %8 = vector.multi_reduction <add>, %7, %cst_2 [1] : vector<16x32xf32> to vector<16xf32>
    %9 = vector.shape_cast %8 : vector<16xf32> to vector<16x1xf32>
    %cst_3 = arith.constant 3.200000e+01 : f32
    %10 = vector.broadcast %cst_3 : f32 to vector<16x1xf32>
    %11 = arith.divf %9, %10 : vector<16x1xf32>
    %cst_4 = arith.constant 9.99999997E-7 : f32
    %12 = vector.broadcast %cst_4 : f32 to vector<16x1xf32>
    %13 = arith.addf %11, %12 : vector<16x1xf32>
    %14 = math.rsqrt %13 : vector<16x1xf32>
    %15 = vector.broadcast %14 : vector<16x1xf32> to vector<16x32xf32>
    %16 = arith.mulf %6, %15 : vector<16x32xf32>
    %c0_5 = arith.constant 0 : index
    %c0_6 = arith.constant 0 : index
    %17 = vector.load %arg3[%c0_5, %c0_6] : memref<1x32xf32, #tpu.memory_space<vmem>>, vector<1x32xf32>
    %18 = vector.broadcast %17 : vector<1x32xf32> to vector<16x32xf32>
    %19 = arith.mulf %16, %18 : vector<16x32xf32>
    %c0_7 = arith.constant 0 : index
    %c0_8 = arith.constant 0 : index
    %20 = vector.load %arg4[%c0_7, %c0_8] : memref<1x32xf32, #tpu.memory_space<vmem>>, vector<1x32xf32>
    %21 = vector.broadcast %20 : vector<1x32xf32> to vector<16x32xf32>
    %22 = arith.addf %19, %21 : vector<16x32xf32>
    %c0_9 = arith.constant 0 : index
    %c0_10 = arith.constant 0 : index
    %23 = vector.load %arg5[%c0_9, %c0_10] : memref<32x128xf32, #tpu.memory_space<vmem>>, vector<32x128xf32>
    %cst_11 = arith.constant dense<0.000000e+00> : vector<16x128xf32>
    %24 = tpu.matmul %22, %23, %cst_11 {dimension_numbers = #tpu.dot_dimension_numbers<[1], [0], [0], [1], [0, 0, 1, 1], [], []>} : vector<16x32xf32>, vector<32x128xf32>, vector<16x128xf32> -> vector<16x128xf32>
    %c0_12 = arith.constant 0 : index
    %c0_13 = arith.constant 0 : index
    %25 = vector.load %arg6[%c0_12, %c0_13] : memref<1x128xf32, #tpu.memory_space<vmem>>, vector<1x128xf32>
    %26 = vector.broadcast %25 : vector<1x128xf32> to vector<16x128xf32>
    %27 = arith.addf %24, %26 : vector<16x128xf32>
    %cst_14 = arith.constant 5.000000e-01 : f32
    %28 = vector.broadcast %cst_14 : f32 to vector<16x128xf32>
    %29 = arith.mulf %28, %27 : vector<16x128xf32>
    %cst_15 = arith.constant 4.471500e-02 : f32
    %30 = vector.broadcast %cst_15 : f32 to vector<16x128xf32>
    %31 = arith.mulf %30, %27 : vector<16x128xf32>
    %32 = arith.mulf %31, %27 : vector<16x128xf32>
    %33 = arith.mulf %32, %27 : vector<16x128xf32>
    %34 = arith.addf %27, %33 : vector<16x128xf32>
    %cst_16 = arith.constant 0.797884583 : f32
    %35 = vector.broadcast %cst_16 : f32 to vector<16x128xf32>
    %36 = arith.mulf %35, %34 : vector<16x128xf32>
    %37 = math.tanh %36 : vector<16x128xf32>
    %cst_17 = arith.constant 1.000000e+00 : f32
    %38 = vector.broadcast %cst_17 : f32 to vector<16x128xf32>
    %39 = arith.addf %38, %37 : vector<16x128xf32>
    %40 = arith.mulf %29, %39 : vector<16x128xf32>
    %c0_18 = arith.constant 0 : index
    %c0_19 = arith.constant 0 : index
    %41 = vector.load %arg7[%c0_18, %c0_19] : memref<16x128xf32, #tpu.memory_space<vmem>>, vector<16x128xf32>
    tpu.vector_store %arg7[%c0_18, %c0_19], %40 {strides = array<i32>} : memref<16x128xf32, #tpu.memory_space<vmem>>, vector<16x128xf32>,
    return
  }
  func.func @transform_0(%arg0: i32, %arg1: i32) -> (i32, i32) {
    %c0_i32 = arith.constant 0 : i32
    %c0_i32_0 = arith.constant 0 : i32
    return %arg0, %c0_i32 : i32, i32
  }
  func.func @transform_1(%arg0: i32, %arg1: i32) -> (i32, i32) {
    %c0_i32 = arith.constant 0 : i32
    %c0_i32_0 = arith.constant 0 : i32
    %c0_i32_1 = arith.constant 0 : i32
    return %c0_i32, %c0_i32_0 : i32, i32
  }
  func.func @transform_2(%arg0: i32, %arg1: i32) -> (i32, i32) {
    %c0_i32 = arith.constant 0 : i32
    %c0_i32_0 = arith.constant 0 : i32
    %c0_i32_1 = arith.constant 0 : i32
    return %c0_i32, %c0_i32_0 : i32, i32
  }
  func.func @transform_3(%arg0: i32, %arg1: i32) -> (i32, i32) {
    %c0_i32 = arith.constant 0 : i32
    %c0_i32_0 = arith.constant 0 : i32
    return %c0_i32, %arg1 : i32, i32
  }
  func.func @transform_4(%arg0: i32, %arg1: i32) -> (i32, i32) {
    %c0_i32 = arith.constant 0 : i32
    %c0_i32_0 = arith.constant 0 : i32
    return %c0_i32, %arg1 : i32, i32
  }
  func.func @transform_5(%arg0: i32, %arg1: i32) -> (i32, i32) {
    %c0_i32 = arith.constant 0 : i32
    return %arg0, %arg1 : i32, i32
  }
}

module attributes {stable_mosaic.version = 11 : i64} {
  func.func @kernel(%arg0: i32, %arg1: i32, %arg2: memref<16x128xf32, #tpu.memory_space<vmem>>, %arg3: memref<128x32xf32, #tpu.memory_space<vmem>>, %arg4: memref<1x32xf32, #tpu.memory_space<vmem>>, %arg5: memref<16x32xf32, #tpu.memory_space<vmem>>, %arg6: memref<16x32xf32, #tpu.memory_space<vmem>>) attributes {dimension_semantics = [#tpu.dimension_semantics<parallel>, #tpu.dimension_semantics<parallel>], iteration_bounds = array<i64: 1, 1>, scalar_prefetch = 0 : i64, scratch_operands = 0 : i64, tpu.core_type = #tpu.core_type<tc>, window_params = [{transform_indices = @transform_0, window_bounds = array<i64: 16, 128>}, {transform_indices = @transform_1, window_bounds = array<i64: 128, 32>}, {transform_indices = @transform_2, window_bounds = array<i64: 1, 32>}, {transform_indices = @transform_3, window_bounds = array<i64: 16, 32>}, {transform_indices = @transform_4, window_bounds = array<i64: 16, 32>}]} {
    %c0 = arith.constant 0 : index
    %c0_0 = arith.constant 0 : index
    %0 = vector.load %arg2[%c0, %c0_0] : memref<16x128xf32, #tpu.memory_space<vmem>>, vector<16x128xf32>
    %c0_1 = arith.constant 0 : index
    %c0_2 = arith.constant 0 : index
    %1 = vector.load %arg3[%c0_1, %c0_2] : memref<128x32xf32, #tpu.memory_space<vmem>>, vector<128x32xf32>
    %cst = arith.constant dense<0.000000e+00> : vector<16x32xf32>
    %2 = tpu.matmul %0, %1, %cst {dimension_numbers = #tpu.dot_dimension_numbers<[1], [0], [0], [1], [0, 0, 1, 1], [], []>} : vector<16x128xf32>, vector<128x32xf32>, vector<16x32xf32> -> vector<16x32xf32>
    %c0_3 = arith.constant 0 : index
    %c0_4 = arith.constant 0 : index
    %3 = vector.load %arg4[%c0_3, %c0_4] : memref<1x32xf32, #tpu.memory_space<vmem>>, vector<1x32xf32>
    %4 = vector.broadcast %3 : vector<1x32xf32> to vector<16x32xf32>
    %5 = arith.addf %2, %4 : vector<16x32xf32>
    %c0_5 = arith.constant 0 : index
    %c0_6 = arith.constant 0 : index
    %6 = vector.load %arg5[%c0_5, %c0_6] : memref<16x32xf32, #tpu.memory_space<vmem>>, vector<16x32xf32>
    %7 = arith.addf %5, %6 : vector<16x32xf32>
    %c0_7 = arith.constant 0 : index
    %c0_8 = arith.constant 0 : index
    %8 = vector.load %arg6[%c0_7, %c0_8] : memref<16x32xf32, #tpu.memory_space<vmem>>, vector<16x32xf32>
    tpu.vector_store %arg6[%c0_7, %c0_8], %7 {strides = array<i32>} : memref<16x32xf32, #tpu.memory_space<vmem>>, vector<16x32xf32>,
    return
  }
  func.func @transform_0(%arg0: i32, %arg1: i32) -> (i32, i32) {
    %c0_i32 = arith.constant 0 : i32
    %c0_i32_0 = arith.constant 0 : i32
    return %arg0, %c0_i32 : i32, i32
  }
  func.func @transform_1(%arg0: i32, %arg1: i32) -> (i32, i32) {
    %c0_i32 = arith.constant 0 : i32
    %c0_i32_0 = arith.constant 0 : i32
    return %c0_i32, %arg1 : i32, i32
  }
  func.func @transform_2(%arg0: i32, %arg1: i32) -> (i32, i32) {
    %c0_i32 = arith.constant 0 : i32
    %c0_i32_0 = arith.constant 0 : i32
    return %c0_i32, %arg1 : i32, i32
  }
  func.func @transform_3(%arg0: i32, %arg1: i32) -> (i32, i32) {
    %c0_i32 = arith.constant 0 : i32
    return %arg0, %arg1 : i32, i32
  }
  func.func @transform_4(%arg0: i32, %arg1: i32) -> (i32, i32) {
    %c0_i32 = arith.constant 0 : i32
    return %arg0, %arg1 : i32, i32
  }
}

module attributes {stable_mosaic.version = 11 : i64} {
  func.func @kernel(%arg0: i32, %arg1: i32, %arg2: memref<2x32xf32, #tpu.memory_space<vmem>>, %arg3: memref<1x32xf32, #tpu.memory_space<vmem>>, %arg4: memref<1x32xf32, #tpu.memory_space<vmem>>, %arg5: memref<32x10xf32, #tpu.memory_space<vmem>>, %arg6: memref<1x10xf32, #tpu.memory_space<vmem>>, %arg7: memref<2x10xf32, #tpu.memory_space<vmem>>) attributes {dimension_semantics = [#tpu.dimension_semantics<parallel>, #tpu.dimension_semantics<parallel>], iteration_bounds = array<i64: 1, 1>, scalar_prefetch = 0 : i64, scratch_operands = 0 : i64, tpu.core_type = #tpu.core_type<tc>, window_params = [{transform_indices = @transform_0, window_bounds = array<i64: 2, 32>}, {pipeline_mode = #tpu.pipeline_mode<synchronous>, transform_indices = @transform_1, window_bounds = array<i64: 1, 32>}, {pipeline_mode = #tpu.pipeline_mode<synchronous>, transform_indices = @transform_2, window_bounds = array<i64: 1, 32>}, {transform_indices = @transform_3, window_bounds = array<i64: 32, 10>}, {transform_indices = @transform_4, window_bounds = array<i64: 1, 10>}, {transform_indices = @transform_5, window_bounds = array<i64: 2, 10>}]} {
    %c0 = arith.constant 0 : index
    %c0_0 = arith.constant 0 : index
    %0 = vector.load %arg2[%c0, %c0_0] : memref<2x32xf32, #tpu.memory_space<vmem>>, vector<2x32xf32>
    %cst = arith.constant dense<0.000000e+00> : vector<2xf32>
    %1 = vector.multi_reduction <add>, %0, %cst [1] : vector<2x32xf32> to vector<2xf32>
    %2 = vector.shape_cast %1 : vector<2xf32> to vector<2x1xf32>
    %cst_1 = arith.constant 3.200000e+01 : f32
    %3 = vector.broadcast %cst_1 : f32 to vector<2x1xf32>
    %4 = arith.divf %2, %3 : vector<2x1xf32>
    %5 = vector.broadcast %4 : vector<2x1xf32> to vector<2x32xf32>
    %6 = arith.subf %0, %5 : vector<2x32xf32>
    %7 = arith.mulf %6, %6 : vector<2x32xf32>
    %cst_2 = arith.constant dense<0.000000e+00> : vector<2xf32>
    %8 = vector.multi_reduction <add>, %7, %cst_2 [1] : vector<2x32xf32> to vector<2xf32>
    %9 = vector.shape_cast %8 : vector<2xf32> to vector<2x1xf32>
    %cst_3 = arith.constant 3.200000e+01 : f32
    %10 = vector.broadcast %cst_3 : f32 to vector<2x1xf32>
    %11 = arith.divf %9, %10 : vector<2x1xf32>
    %cst_4 = arith.constant 9.99999997E-7 : f32
    %12 = vector.broadcast %cst_4 : f32 to vector<2x1xf32>
    %13 = arith.addf %11, %12 : vector<2x1xf32>
    %14 = math.rsqrt %13 : vector<2x1xf32>
    %15 = vector.broadcast %14 : vector<2x1xf32> to vector<2x32xf32>
    %16 = arith.mulf %6, %15 : vector<2x32xf32>
    %c0_5 = arith.constant 0 : index
    %c0_6 = arith.constant 0 : index
    %17 = vector.load %arg3[%c0_5, %c0_6] : memref<1x32xf32, #tpu.memory_space<vmem>>, vector<1x32xf32>
    %18 = vector.broadcast %17 : vector<1x32xf32> to vector<2x32xf32>
    %19 = arith.mulf %16, %18 : vector<2x32xf32>
    %c0_7 = arith.constant 0 : index
    %c0_8 = arith.constant 0 : index
    %20 = vector.load %arg4[%c0_7, %c0_8] : memref<1x32xf32, #tpu.memory_space<vmem>>, vector<1x32xf32>
    %21 = vector.broadcast %20 : vector<1x32xf32> to vector<2x32xf32>
    %22 = arith.addf %19, %21 : vector<2x32xf32>
    %c0_9 = arith.constant 0 : index
    %c0_10 = arith.constant 0 : index
    %23 = vector.load %arg5[%c0_9, %c0_10] : memref<32x10xf32, #tpu.memory_space<vmem>>, vector<32x10xf32>
    %cst_11 = arith.constant dense<0.000000e+00> : vector<2x10xf32>
    %24 = tpu.matmul %22, %23, %cst_11 {dimension_numbers = #tpu.dot_dimension_numbers<[1], [0], [0], [1], [0, 0, 1, 1], [], []>} : vector<2x32xf32>, vector<32x10xf32>, vector<2x10xf32> -> vector<2x10xf32>
    %c0_12 = arith.constant 0 : index
    %c0_13 = arith.constant 0 : index
    %25 = vector.load %arg6[%c0_12, %c0_13] : memref<1x10xf32, #tpu.memory_space<vmem>>, vector<1x10xf32>
    %26 = vector.broadcast %25 : vector<1x10xf32> to vector<2x10xf32>
    %27 = arith.addf %24, %26 : vector<2x10xf32>
    %c0_14 = arith.constant 0 : index
    %c0_15 = arith.constant 0 : index
    %28 = vector.load %arg7[%c0_14, %c0_15] : memref<2x10xf32, #tpu.memory_space<vmem>>, vector<2x10xf32>
    tpu.vector_store %arg7[%c0_14, %c0_15], %27 {strides = array<i32>} : memref<2x10xf32, #tpu.memory_space<vmem>>, vector<2x10xf32>,
    return
  }
  func.func @transform_0(%arg0: i32, %arg1: i32) -> (i32, i32) {
    %c0_i32 = arith.constant 0 : i32
    %c0_i32_0 = arith.constant 0 : i32
    return %arg0, %c0_i32 : i32, i32
  }
  func.func @transform_1(%arg0: i32, %arg1: i32) -> (i32, i32) {
    %c0_i32 = arith.constant 0 : i32
    %c0_i32_0 = arith.constant 0 : i32
    %c0_i32_1 = arith.constant 0 : i32
    return %c0_i32, %c0_i32_0 : i32, i32
  }
  func.func @transform_2(%arg0: i32, %arg1: i32) -> (i32, i32) {
    %c0_i32 = arith.constant 0 : i32
    %c0_i32_0 = arith.constant 0 : i32
    %c0_i32_1 = arith.constant 0 : i32
    return %c0_i32, %c0_i32_0 : i32, i32
  }
  func.func @transform_3(%arg0: i32, %arg1: i32) -> (i32, i32) {
    %c0_i32 = arith.constant 0 : i32
    %c0_i32_0 = arith.constant 0 : i32
    return %c0_i32, %arg1 : i32, i32
  }
  func.func @transform_4(%arg0: i32, %arg1: i32) -> (i32, i32) {
    %c0_i32 = arith.constant 0 : i32
    %c0_i32_0 = arith.constant 0 : i32
    return %c0_i32, %arg1 : i32, i32
  }
  func.func @transform_5(%arg0: i32, %arg1: i32) -> (i32, i32) {
    %c0_i32 = arith.constant 0 : i32
    return %arg0, %arg1 : i32, i32
  }
}

</mosaic_0001>

<bundles_post_ra>
// kernel: vit_forward.13
= control target key start
LH: loop header
LB: loop body
LE: loop exit
PB: predicated region body
PF: predicated region fallthrough
CT: control target
= control target key end

     0   :  { %vm22_vm0 = vcmask 261120   ;;  %vm160_vm1 = vcmask 785408   ;;  %s270_s0 = inlined_call_operand.vmem [shape: f32[16,32], index: 0, kind: input, shape index: {}]   ;;  %s271_s3 = inlined_call_operand.vmem [shape: f32[32,96], index: 3, kind: input, shape index: {}]   ;;  %s272_s1 = inlined_call_operand.vmem [shape: f32[1,32], index: 1, kind: input, shape index: {}]   ;;  %s273_s2 = inlined_call_operand.vmem [shape: f32[1,32], index: 2, kind: input, shape index: {}]   ;;  %s274_s4 = inlined_call_operand.vmem [shape: f32[1,96], index: 4, kind: input, shape index: {}]   ;;  %s275_s5 = inlined_call_operand.vmem [shape: f32[16,96], index: 5, kind: output, shape index: {}]  }
   0x1   :  { %v20_v0 = vld [vmem:[%s270_s0] sm:$0xff]  ;;  %v21_v1 = vld [vmem:[%s270_s0 + $0x8] sm:$0xff]  ;;  %v70_v16 = vld [vmem:[%s271_s3 + $0x10] sm:$0xff] }
   0x2   :  { %v23_v2 = vsel %vm22_vm0, %v20_v0, 0.0  ;;  %v26_v3 = vsel %vm22_vm0, %v21_v1, 0.0  ;;  %v68_v14 = vld [vmem:[%s271_s3] sm:$0xff]  ;;  %v69_v15 = vld [vmem:[%s271_s3 + $0x8] sm:$0xff]  ;;  %v71_v18 = vld [vmem:[%s271_s3 + $0x18] sm:$0xff] }
   0x3   :  { %24 = vadd.xlane.f32.xlu0 %v23_v2  ;;  %v189_v17 = vpack.c.bf16 %v69_v15, %v68_v14  ;;  %v193_v19 = vpack.c.bf16 %v71_v18, %v70_v16  ;;  %v167_v27 = vld [vmem:[%s272_s1] ss:$0 sm:$0xff] }
   0x4   :  { %v168_v29 = vld [vmem:[%s273_s2] ss:$0 sm:$0xff] }
   0x5   :  { %190 = vmatprep.subr.bf16.mxu0 %v189_v17  ;;  %v169_v36 = vld [vmem:[%s274_s4] ss:$0 sm:$0xff] }
   0x6   :  { %192 = vmatpush3.bf16.msra.mxu0 %v189_v17 }
   0x7   :  { %27 = vadd.xlane.f32.xlu0 %v26_v3  ;;  %194 = vmatprep.subr.bf16.mxu0 %v193_v19 }
   0xa   :  { %196 = vmatpush3.bf16.msra.mxu0 %v193_v19 }
  0x90   :  { %v25_v4 = vpop.xlane.xlu0 %24 }
  0x91   :  { %v30_v5 = vmul.f32 0.03125, %v25_v4 }
  0x93   :  { %v32_v6 = vsub.f32 %v20_v0, %v30_v5 }
  0x94   :  { %v28_v7 = vpop.xlane.xlu0 %27 }
  0x95   :  { %v31_v8 = vmul.f32 0.03125, %v28_v7  ;;  %v34_v9 = vmul.f32 %v32_v6, %v32_v6 }
  0x97   :  { %v33_v10 = vsub.f32 %v21_v1, %v31_v8  ;;  %v36_v11 = vsel %vm22_vm0, %v34_v9, 0.0 }
  0x98   :  { %37 = vadd.xlane.f32.xlu1 %v36_v11 }
  0x99   :  { %v35_v12 = vmul.f32 %v33_v10, %v33_v10 }
  0x9b   :  { %v39_v13 = vsel %vm22_vm0, %v35_v12, 0.0 }
  0x9c   :  { %40 = vadd.xlane.f32.xlu1 %v39_v13 }
 0x125   :  { %v38_v20 = vpop.xlane.xlu1 %37 }
 0x126   :  { %v42_v21 = vmul.f32 0.03125, %v38_v20 }
 0x128   :  { %v44_v22 = vadd.f32 1e-06, %v42_v21 }
 0x129   :  { %v41_v23 = vpop.xlane.xlu1 %40 }
 0x12a   :  { %197 = vrsqrt.f32 %v44_v22  ;;  %v43_v24 = vmul.f32 0.03125, %v41_v23 }
 0x12c   :  { %v45_v25 = vadd.f32 1e-06, %v43_v24 }
 0x12e   :  { %199 = vrsqrt.f32 %v45_v25 }
 0x134   :  { %v198_v26 = vpop.eup %197 }
 0x135   :  { %v48_v28 = vmul.f32 %v198_v26, %v32_v6 }
 0x137   :  { %v57_v30 = vmul.f32 %v167_v27, %v48_v28 }
 0x138   :  { %v200_v31 = vpop.eup %199 }
 0x139   :  { %v49_v32 = vmul.f32 %v200_v31, %v33_v10  ;;  %v66_v33 = vadd.f32 %v168_v29, %v57_v30 }
 0x13b   :  { %v58_v34 = vmul.f32 %v167_v27, %v49_v32  ;;  %186 = vmatprep.mubr.msk.f32.mxu0 %vm22_vm0, %v66_v33 }
 0x13d   :  { %v67_v35 = vadd.f32 %v168_v29, %v58_v34 }
 0x13f   :  { %187 = vmatmul.mubr.msk.f32.vlgmr.msra.gmra.mrb[0].mxu0 %vm22_vm0, %v67_v35 }
 0x212   :  { %v188_v37 = vpop.f32.mrb[0].mxu0 }
 0x213   :  { %v157_v38 = vadd.f32 %v188_v37, %v169_v36  ;;  %v151_v39 = vpop.f32.mrb[1].mxu0 }
 0x214   :  { %v152_v40 = vadd.f32 %v169_v36, %v151_v39 }
 0x215   :  { %162 = vst.msk [vmem:[%s275_s5 + $0x8] sm:$0xff] %vm160_vm1, %v157_v38 }
 0x216   :  { %161 = vst.msk [vmem:[%s275_s5] sm:$0xff] %vm160_vm1, %v152_v40 }

// kernel: vit_forward.15
= control target key start
LH: loop header
LB: loop body
LE: loop exit
PB: predicated region body
PF: predicated region fallthrough
CT: control target
= control target key end

     0   :  { %vm30_vm0 = vcmask 261120   ;;  %s212_s1 = inlined_call_operand.vmem [shape: f32[32,32], index: 1, kind: input, shape index: {}]   ;;  %s213_s0 = inlined_call_operand.vmem [shape: f32[16,32], index: 0, kind: input, shape index: {}]   ;;  %s214_s2 = inlined_call_operand.vmem [shape: f32[1,32], index: 2, kind: input, shape index: {}]   ;;  %s215_s3 = inlined_call_operand.vmem [shape: f32[16,32], index: 3, kind: input, shape index: {}]   ;;  %s216_s4 = inlined_call_operand.vmem [shape: f32[16,32], index: 4, kind: output, shape index: {}]  }
   0x1   :  { %v19_v0 = vld [vmem:[%s212_s1] sm:$0xff]  ;;  %v20_v1 = vld [vmem:[%s212_s1 + $0x8] sm:$0xff]  ;;  %v21_v2 = vld [vmem:[%s212_s1 + $0x10] sm:$0xff] }
   0x2   :  { %v142_v3 = vpack.c.bf16 %v20_v1, %v19_v0  ;;  %v22_v4 = vld [vmem:[%s212_s1 + $0x18] sm:$0xff]  ;;  %v17_v5 = vld [vmem:[%s213_s0] sm:$0xff]  ;;  %v18_v7 = vld [vmem:[%s213_s0 + $0x8] sm:$0xff] }
   0x3   :  { %v146_v6 = vpack.c.bf16 %v22_v4, %v21_v2  ;;  %139 = vmatprep.mubr.msk.f32.mxu0 %vm30_vm0, %v17_v5  ;;  %v122_v8 = vld [vmem:[%s214_s2] ss:$0 sm:$0xff]  ;;  %v113_v10 = vld [vmem:[%s215_s3 + $0x8] sm:$0xff] }
   0x4   :  { %143 = vmatprep.subr.bf16.mxu0 %v142_v3  ;;  %v112_v13 = vld [vmem:[%s215_s3] sm:$0xff] }
   0x5   :  { %145 = vmatpush3.bf16.msra.mxu0 %v142_v3 }
   0x6   :  { %147 = vmatprep.subr.bf16.mxu0 %v146_v6 }
   0x9   :  { %149 = vmatpush3.bf16.msra.mxu0 %v146_v6 }
   0xc   :  { %140 = vmatmul.mubr.msk.f32.vlgmr.msra.gmra.mrb[0].mxu0 %vm30_vm0, %v18_v7 }
  0xdf   :  { %v141_v9 = vpop.f32.mrb[0].mxu0 }
  0xe0   :  { %v109_v11 = vadd.f32 %v141_v9, %v122_v8  ;;  %v103_v12 = vpop.f32.mrb[1].mxu0 }
  0xe1   :  { %v104_v14 = vadd.f32 %v122_v8, %v103_v12 }
  0xe2   :  { %v115_v15 = vadd.f32 %v113_v10, %v109_v11 }
  0xe3   :  { %v114_v16 = vadd.f32 %v112_v13, %v104_v14 }
  0xe4   :  { %117 = vst.msk [vmem:[%s216_s4 + $0x8] sm:$0xff] %vm30_vm0, %v115_v15 }
  0xe5   :  { %116 = vst.msk [vmem:[%s216_s4] sm:$0xff] %vm30_vm0, %v114_v16 }

// kernel: vit_forward.12
= control target key start
LH: loop header
LB: loop body
LE: loop exit
PB: predicated region body
PF: predicated region fallthrough
CT: control target
= control target key end

     0   :  { %vm333_vm0 = vcmask 261120   ;;  %s873_s1 = inlined_call_operand.vmem [shape: f32[768,32], index: 1, kind: input, shape index: {}]   ;;  %s874_s0 = inlined_call_operand.vmem [shape: f32[8,768], index: 0, kind: input, shape index: {}]   ;;  %s875_s2 = inlined_call_operand.vmem [shape: f32[1,32], index: 2, kind: input, shape index: {}]   ;;  %s876_s3 = inlined_call_operand.vmem [shape: f32[8,32], index: 3, kind: output, shape index: {}]  }
   0x1   :  { %v36_v0 = vld [vmem:[%s873_s1 + $0x80] sm:$0xff]  ;;  %v37_v1 = vld [vmem:[%s873_s1 + $0x88] sm:$0xff]  ;;  %v38_v11 = vld [vmem:[%s873_s1 + $0x90] sm:$0xff] }
   0x2   :  { %v20_v2 = vld [vmem:[%s873_s1] sm:$0xff]  ;;  %v445_v3 = vpack.c.bf16 %v37_v1, %v36_v0  ;;  %v21_v4 = vld [vmem:[%s873_s1 + $0x8] sm:$0xff]  ;;  %v39_v13 = vld [vmem:[%s873_s1 + $0x98] sm:$0xff] }
   0x3   :  { %v68_v5 = vld [vmem:[%s873_s1 + $0x180] sm:$0xff]  ;;  %v69_v6 = vld [vmem:[%s873_s1 + $0x188] sm:$0xff]  ;;  %v447_v7 = vpack.c.bf16 %v21_v4, %v20_v2  ;;  %v22_v14 = vld [vmem:[%s873_s1 + $0x10] sm:$0xff]  ;;  %v449_v16 = vpack.c.bf16 %v39_v13, %v38_v11 }
   0x4   :  { %v477_v8 = vpack.c.bf16 %v69_v6, %v68_v5  ;;  %v52_v9 = vld [vmem:[%s873_s1 + $0x100] sm:$0xff]  ;;  %v53_v10 = vld [vmem:[%s873_s1 + $0x108] sm:$0xff]  ;;  %446 = vmatprep.subr.bf16.mxu0 %v445_v3  ;;  %v23_v15 = vld [vmem:[%s873_s1 + $0x18] sm:$0xff] }
   0x5   :  { %v479_v12 = vpack.c.bf16 %v53_v10, %v52_v9  ;;  %448 = vmatpush3.bf16.msra.mxu0 %v447_v7  ;;  %v451_v17 = vpack.c.bf16 %v23_v15, %v22_v14  ;;  %v70_v18 = vld [vmem:[%s873_s1 + $0x190] sm:$0xff]  ;;  %v71_v19 = vld [vmem:[%s873_s1 + $0x198] sm:$0xff]  ;;  %v40_v23 = vld [vmem:[%s873_s1 + $0xa0] sm:$0xff] }
   0x6   :  { %478 = vmatprep.subr.bf16.mxu1 %v477_v8  ;;  %v54_v20 = vld [vmem:[%s873_s1 + $0x110] sm:$0xff]  ;;  %v481_v21 = vpack.c.bf16 %v71_v19, %v70_v18  ;;  %v55_v22 = vld [vmem:[%s873_s1 + $0x118] sm:$0xff]  ;;  %v41_v24 = vld [vmem:[%s873_s1 + $0xa8] sm:$0xff]  ;;  %450 = vmatprep.subr.bf16.mxu0 %v449_v16 }
   0x7   :  { %480 = vmatpush3.bf16.msra.mxu1 %v479_v12  ;;  %v483_v25 = vpack.c.bf16 %v55_v22, %v54_v20  ;;  %v453_v26 = vpack.c.bf16 %v41_v24, %v40_v23  ;;  %v24_v27 = vld [vmem:[%s873_s1 + $0x20] sm:$0xff]  ;;  %v25_v28 = vld [vmem:[%s873_s1 + $0x28] sm:$0xff]  ;;  %v42_v35 = vld [vmem:[%s873_s1 + $0xb0] sm:$0xff] }
   0x8   :  { %v72_v29 = vld [vmem:[%s873_s1 + $0x1a0] sm:$0xff]  ;;  %482 = vmatprep.subr.bf16.mxu1 %v481_v21  ;;  %v73_v30 = vld [vmem:[%s873_s1 + $0x1a8] sm:$0xff]  ;;  %v455_v33 = vpack.c.bf16 %v25_v28, %v24_v27  ;;  %v43_v36 = vld [vmem:[%s873_s1 + $0xb8] sm:$0xff] }
   0x9   :  { %v56_v31 = vld [vmem:[%s873_s1 + $0x120] sm:$0xff]  ;;  %v57_v32 = vld [vmem:[%s873_s1 + $0x128] sm:$0xff]  ;;  %452 = vmatpush3.bf16.msra.mxu0 %v451_v17  ;;  %v485_v34 = vpack.c.bf16 %v73_v30, %v72_v29  ;;  %v26_v37 = vld [vmem:[%s873_s1 + $0x30] sm:$0xff]  ;;  %v457_v39 = vpack.c.bf16 %v43_v36, %v42_v35 }
   0xa   :  { %454 = vmatprep.subr.bf16.mxu0 %v453_v26  ;;  %v487_v38 = vpack.c.bf16 %v57_v32, %v56_v31  ;;  %v27_v40 = vld [vmem:[%s873_s1 + $0x38] sm:$0xff]  ;;  %v74_v41 = vld [vmem:[%s873_s1 + $0x1b0] sm:$0xff]  ;;  %v44_v46 = vld [vmem:[%s873_s1 + $0xc0] sm:$0xff] }
   0xb   :  { %484 = vmatpush3.bf16.msra.mxu1 %v483_v25  ;;  %v75_v42 = vld [vmem:[%s873_s1 + $0x1b8] sm:$0xff]  ;;  %v58_v44 = vld [vmem:[%s873_s1 + $0x130] sm:$0xff]  ;;  %v45_v47 = vld [vmem:[%s873_s1 + $0xc8] sm:$0xff]  ;;  %v459_v48 = vpack.c.bf16 %v27_v40, %v26_v37 }
   0xc   :  { %486 = vmatprep.subr.bf16.mxu1 %v485_v34  ;;  %v489_v43 = vpack.c.bf16 %v75_v42, %v74_v41  ;;  %v59_v45 = vld [vmem:[%s873_s1 + $0x138] sm:$0xff]  ;;  %v76_v49 = vld [vmem:[%s873_s1 + $0x1c0] sm:$0xff]  ;;  %v77_v50 = vld [vmem:[%s873_s1 + $0x1c8] sm:$0xff]  ;;  %v461_v52 = vpack.c.bf16 %v45_v47, %v44_v46 }
   0xd   :  { %456 = vmatpush3.bf16.msra.mxu0 %v455_v33  ;;  %v491_v51 = vpack.c.bf16 %v59_v45, %v58_v44  ;;  %v28_v53 = vld [vmem:[%s873_s1 + $0x40] sm:$0xff]  ;;  %v29_v54 = vld [vmem:[%s873_s1 + $0x48] sm:$0xff]  ;;  %v493_v56 = vpack.c.bf16 %v77_v50, %v76_v49  ;;  %v46_v58 = vld [vmem:[%s873_s1 + $0xd0] sm:$0xff] }
   0xe   :  { %458 = vmatprep.subr.bf16.mxu0 %v457_v39  ;;  %v60_v55 = vld [vmem:[%s873_s1 + $0x140] sm:$0xff]  ;;  %v61_v57 = vld [vmem:[%s873_s1 + $0x148] sm:$0xff]  ;;  %v47_v59 = vld [vmem:[%s873_s1 + $0xd8] sm:$0xff]  ;;  %v463_v62 = vpack.c.bf16 %v29_v54, %v28_v53 }
   0xf   :  { %488 = vmatpush3.bf16.msra.mxu1 %v487_v38  ;;  %v78_v60 = vld [vmem:[%s873_s1 + $0x1d0] sm:$0xff]  ;;  %v79_v61 = vld [vmem:[%s873_s1 + $0x1d8] sm:$0xff]  ;;  %v495_v63 = vpack.c.bf16 %v61_v57, %v60_v55  ;;  %v465_v0 = vpack.c.bf16 %v47_v59, %v46_v58  ;;  %v48_v6 = vld [vmem:[%s873_s1 + $0xe0] sm:$0xff] }
  0x10   :  { %490 = vmatprep.subr.bf16.mxu1 %v489_v43  ;;  %v30_v1 = vld [vmem:[%s873_s1 + $0x50] sm:$0xff]  ;;  %v31_v2 = vld [vmem:[%s873_s1 + $0x58] sm:$0xff]  ;;  %v497_v4 = vpack.c.bf16 %v79_v61, %v78_v60  ;;  %v49_v7 = vld [vmem:[%s873_s1 + $0xe8] sm:$0xff] }
  0x11   :  { %460 = vmatpush3.bf16.msra.mxu0 %v459_v48  ;;  %v62_v3 = vld [vmem:[%s873_s1 + $0x150] sm:$0xff]  ;;  %v63_v5 = vld [vmem:[%s873_s1 + $0x158] sm:$0xff]  ;;  %v80_v8 = vld [vmem:[%s873_s1 + $0x1e0] sm:$0xff]  ;;  %v467_v10 = vpack.c.bf16 %v31_v2, %v30_v1  ;;  %v469_v14 = vpack.c.bf16 %v49_v7, %v48_v6 }
  0x12   :  { %462 = vmatprep.subr.bf16.mxu0 %v461_v52  ;;  %v81_v9 = vld [vmem:[%s873_s1 + $0x1e8] sm:$0xff]  ;;  %v32_v11 = vld [vmem:[%s873_s1 + $0x60] sm:$0xff]  ;;  %v499_v13 = vpack.c.bf16 %v63_v5, %v62_v3  ;;  %v50_v19 = vld [vmem:[%s873_s1 + $0xf0] sm:$0xff] }
  0x13   :  { %492 = vmatpush3.bf16.msra.mxu1 %v491_v51  ;;  %v15_v12 = vld [vmem:[%s874_s0 + $0x8] sm:$0xff]  ;;  %v64_v16 = vld [vmem:[%s873_s1 + $0x160] sm:$0xff]  ;;  %v501_v18 = vpack.c.bf16 %v81_v9, %v80_v8  ;;  %v51_v20 = vld [vmem:[%s873_s1 + $0xf8] sm:$0xff] }
  0x14   :  { %494 = vmatprep.subr.bf16.mxu1 %v493_v56  ;;  %v33_v15 = vld [vmem:[%s873_s1 + $0x68] sm:$0xff]  ;;  %187 = vmatprep.mubr.f32.mxu0 %v15_v12  ;;  %v17_v21 = vld [vmem:[%s874_s0 + $0x18] sm:$0xff]  ;;  %v82_v22 = vld [vmem:[%s873_s1 + $0x1f0] sm:$0xff]  ;;  %v473_v26 = vpack.c.bf16 %v51_v20, %v50_v19 }
  0x15   :  { %464 = vmatpush3.bf16.msra.mxu0 %v463_v62  ;;  %v65_v17 = vld [vmem:[%s873_s1 + $0x168] sm:$0xff]  ;;  %v83_v23 = vld [vmem:[%s873_s1 + $0x1f8] sm:$0xff]  ;;  %257 = vmatprep.mubr.f32.mxu1 %v17_v21  ;;  %v471_v24 = vpack.c.bf16 %v33_v15, %v32_v11  ;;  %v34_v27 = vld [vmem:[%s873_s1 + $0x70] sm:$0xff] }
  0x16   :  { %466 = vmatprep.subr.bf16.mxu0 %v465_v0  ;;  %v503_v25 = vpack.c.bf16 %v65_v17, %v64_v16  ;;  %v35_v28 = vld [vmem:[%s873_s1 + $0x78] sm:$0xff]  ;;  %v66_v29 = vld [vmem:[%s873_s1 + $0x170] sm:$0xff]  ;;  %v505_v30 = vpack.c.bf16 %v83_v23, %v82_v22  ;;  %v100_v32 = vld [vmem:[%s873_s1 + $0x280] sm:$0xff] }
  0x17   :  { %496 = vmatpush3.bf16.msra.mxu1 %v495_v63  ;;  %v67_v31 = vld [vmem:[%s873_s1 + $0x178] sm:$0xff]  ;;  %v101_v33 = vld [vmem:[%s873_s1 + $0x288] sm:$0xff]  ;;  %v475_v34 = vpack.c.bf16 %v35_v28, %v34_v27  ;;  %v84_v37 = vld [vmem:[%s873_s1 + $0x200] sm:$0xff] }
  0x18   :  { %498 = vmatprep.subr.bf16.mxu1 %v497_v4  ;;  %v507_v35 = vpack.c.bf16 %v67_v31, %v66_v29  ;;  %v509_v36 = vpack.c.bf16 %v101_v33, %v100_v32  ;;  %v85_v38 = vld [vmem:[%s873_s1 + $0x208] sm:$0xff]  ;;  %v102_v39 = vld [vmem:[%s873_s1 + $0x290] sm:$0xff]  ;;  %v103_v40 = vld [vmem:[%s873_s1 + $0x298] sm:$0xff] }
  0x19   :  { %468 = vmatpush3.bf16.msra.mxu0 %v467_v10  ;;  %v14_v41 = vld [vmem:[%s874_s0] sm:$0xff]  ;;  %v511_v42 = vpack.c.bf16 %v85_v38, %v84_v37  ;;  %v16_v43 = vld [vmem:[%s874_s0 + $0x10] sm:$0xff]  ;;  %v513_v44 = vpack.c.bf16 %v103_v40, %v102_v39  ;;  %v87_v46 = vld [vmem:[%s873_s1 + $0x218] sm:$0xff] }
  0x1a   :  { %470 = vmatprep.subr.bf16.mxu0 %v469_v14  ;;  %v86_v45 = vld [vmem:[%s873_s1 + $0x210] sm:$0xff]  ;;  %v104_v47 = vld [vmem:[%s873_s1 + $0x2a0] sm:$0xff]  ;;  %v105_v48 = vld [vmem:[%s873_s1 + $0x2a8] sm:$0xff] }
  0x1b   :  { %500 = vmatpush3.bf16.msra.mxu1 %v499_v13  ;;  %v19_v49 = vld [vmem:[%s874_s0 + $0x28] sm:$0xff]  ;;  %v515_v50 = vpack.c.bf16 %v87_v46, %v86_v45  ;;  %v517_v51 = vpack.c.bf16 %v105_v48, %v104_v47  ;;  %v88_v52 = vld [vmem:[%s873_s1 + $0x220] sm:$0xff]  ;;  %v106_v54 = vld [vmem:[%s873_s1 + $0x2b0] sm:$0xff] }
  0x1c   :  { %502 = vmatprep.subr.bf16.mxu1 %v501_v18  ;;  %v89_v53 = vld [vmem:[%s873_s1 + $0x228] sm:$0xff]  ;;  %v107_v55 = vld [vmem:[%s873_s1 + $0x2b8] sm:$0xff]  ;;  %v90_v58 = vld [vmem:[%s873_s1 + $0x230] sm:$0xff] }
  0x1d   :  { %472 = vmatpush3.bf16.msra.mxu0 %v471_v24  ;;  %v519_v56 = vpack.c.bf16 %v89_v53, %v88_v52  ;;  %v521_v57 = vpack.c.bf16 %v107_v55, %v106_v54  ;;  %v91_v59 = vld [vmem:[%s873_s1 + $0x238] sm:$0xff]  ;;  %v108_v60 = vld [vmem:[%s873_s1 + $0x2c0] sm:$0xff]  ;;  %v109_v61 = vld [vmem:[%s873_s1 + $0x2c8] sm:$0xff] }
  0x1e   :  { %474 = vmatprep.subr.bf16.mxu0 %v473_v26  ;;  %v523_v62 = vpack.c.bf16 %v91_v59, %v90_v58  ;;  %v525_v63 = vpack.c.bf16 %v109_v61, %v108_v60  ;;  %v92_v0 = vld [vmem:[%s873_s1 + $0x240] sm:$0xff]  ;;  %v93_v1 = vld [vmem:[%s873_s1 + $0x248] sm:$0xff]  ;;  %v110_v2 = vld [vmem:[%s873_s1 + $0x2d0] sm:$0xff] }
  0x1f   :  { %504 = vmatpush3.bf16.msra.mxu1 %v503_v25  ;;  %v111_v3 = vld [vmem:[%s873_s1 + $0x2d8] sm:$0xff]  ;;  %v527_v4 = vpack.c.bf16 %v93_v1, %v92_v0  ;;  %v94_v6 = vld [vmem:[%s873_s1 + $0x250] sm:$0xff]  ;;  %v112_v8 = vld [vmem:[%s873_s1 + $0x2e0] sm:$0xff] }
  0x20   :  { %506 = vmatprep.subr.bf16.mxu1 %v505_v30  ;;  %v529_v5 = vpack.c.bf16 %v111_v3, %v110_v2  ;;  %v95_v7 = vld [vmem:[%s873_s1 + $0x258] sm:$0xff]  ;;  %v113_v9 = vld [vmem:[%s873_s1 + $0x2e8] sm:$0xff]  ;;  %v96_v12 = vld [vmem:[%s873_s1 + $0x260] sm:$0xff] }
  0x21   :  { %476 = vmatpush3.bf16.msra.mxu0 %v475_v34  ;;  %v531_v10 = vpack.c.bf16 %v95_v7, %v94_v6  ;;  %v533_v11 = vpack.c.bf16 %v113_v9, %v112_v8  ;;  %v97_v13 = vld [vmem:[%s873_s1 + $0x268] sm:$0xff]  ;;  %v114_v14 = vld [vmem:[%s873_s1 + $0x2f0] sm:$0xff]  ;;  %v115_v15 = vld [vmem:[%s873_s1 + $0x2f8] sm:$0xff] }
  0x22   :  { %510 = vmatprep.subr.bf16.mxu0 %v509_v36  ;;  %v535_v16 = vpack.c.bf16 %v97_v13, %v96_v12  ;;  %v537_v17 = vpack.c.bf16 %v115_v15, %v114_v14  ;;  %v98_v18 = vld [vmem:[%s873_s1 + $0x270] sm:$0xff]  ;;  %v99_v19 = vld [vmem:[%s873_s1 + $0x278] sm:$0xff]  ;;  %v18_v21 = vld [vmem:[%s874_s0 + $0x20] sm:$0xff] }
  0x23   :  { %508 = vmatpush3.bf16.msra.mxu1 %v507_v35  ;;  %v539_v20 = vpack.c.bf16 %v99_v19, %v98_v18  ;;  %v339_v23 = vld [vmem:[%s875_s2] ss:$0 sm:$0xff] }
  0x24   :  { %188 = vmatmul.mubr.f32.vlgmr.msra.gmra.mrb[0].mxu0 %v14_v41 }
  0x25   :  { %512 = vmatpush3.bf16.msra.mxu0 %v511_v42  ;;  %327 = vmatprep.mubr.f32.mxu0 %v19_v49 }
  0x26   :  { %258 = vmatmul.mubr.f32.vlgmr.msra.gmra.mrb[0].mxu1 %v16_v43  ;;  %514 = vmatprep.subr.bf16.mxu0 %v513_v44 }
  0x29   :  { %516 = vmatpush3.bf16.msra.mxu0 %v515_v50 }
  0x2a   :  { %518 = vmatprep.subr.bf16.mxu0 %v517_v51 }
  0x2d   :  { %520 = vmatpush3.bf16.msra.mxu0 %v519_v56 }
  0x2e   :  { %522 = vmatprep.subr.bf16.mxu0 %v521_v57 }
  0x31   :  { %524 = vmatpush3.bf16.msra.mxu0 %v523_v62 }
  0x32   :  { %526 = vmatprep.subr.bf16.mxu0 %v525_v63 }
  0x35   :  { %528 = vmatpush3.bf16.msra.mxu0 %v527_v4 }
  0x36   :  { %530 = vmatprep.subr.bf16.mxu0 %v529_v5 }
  0x39   :  { %532 = vmatpush3.bf16.msra.mxu0 %v531_v10 }
  0x3a   :  { %534 = vmatprep.subr.bf16.mxu0 %v533_v11 }
  0x3d   :  { %536 = vmatpush3.bf16.msra.mxu0 %v535_v16 }
  0x3e   :  { %538 = vmatprep.subr.bf16.mxu0 %v537_v17 }
  0x41   :  { %540 = vmatpush3.bf16.msra.mxu0 %v539_v20 }
  0x44   :  { %328 = vmatmul.mubr.f32.vlgmr.msra.gmra.mrb[2].mxu0 %v18_v21 }
  0xf7   :  { %v372_v22 = vpop.f32.mrb[0].mxu0 }
  0xf8   :  { %v373_v24 = vpop.f32.mrb[1].mxu0 }
  0xf9   :  { %v407_v25 = vpop.f32.mrb[0].mxu1  ;;  %v374_v26 = vadd.f32 %v373_v24, %v372_v22 }
  0xfa   :  { %v408_v27 = vpop.f32.mrb[1].mxu1 }
  0xfb   :  { %v409_v28 = vadd.f32 %v408_v27, %v407_v25  ;;  %v190_v29 = vadd.f32 %v374_v26, %v339_v23 }
  0xfd   :  { %v260_v30 = vadd.f32 %v409_v28, %v190_v29 }
 0x117   :  { %v442_v31 = vpop.f32.mrb[2].mxu0 }
 0x118   :  { %v443_v32 = vpop.f32.mrb[3].mxu0 }
 0x119   :  { %v444_v33 = vadd.f32 %v443_v32, %v442_v31 }
 0x11b   :  { %v330_v34 = vadd.f32 %v444_v33, %v260_v30 }
 0x11d   :  { %334 = vst.msk [vmem:[%s876_s3] sm:$0xff] %vm333_vm0, %v330_v34 }

// kernel: vit_forward.14
= control target key start
LH: loop header
LB: loop body
LE: loop exit
PB: predicated region body
PF: predicated region fallthrough
CT: control target
= control target key end

     0   :  { %s1005_s6 = smov 0   ;;  %s1096_s0 = inlined_call_operand.vmem [shape: f32[2,8,96], index: 0, kind: input, shape index: {}]   ;;  %s1097_s1 = inlined_call_operand.vmem [shape: f32[2,8,32], index: 1, kind: output, shape index: {}]  }
   0x1 LB: > { %s854_s7 = sadd.s32 4294967295, %s977_s6   ;;  %p858_p0 = scmp.ge.s32.totalorder %s977_s6, 1  ;;  %s977_s6 = sphi %s1005_s6, %s11_s6  }
   0x2   : > { %p86_p1 = scmp.lt.s32.totalorder %s977_s6, 3 }
   0x4   : > { %p87_p2 = pnand %p858_p0, %p86_p1 }
   0x5   : > { %p104_p3 = scmp.lt.s32.totalorder (!%p87_p2), %s854_s7, 1  ;;  %v979_v0 = vmov (!%p87_p2), 0.0   ;;  %vm980_vm0 = vmmov (!%p87_p2), 0   ;;  %s981_s12 = smov (!%p87_p2), 96   ;;  %vm117_vm1 = vcmask (!%p87_p2), 64512   ;;  %v193_v4 = vlaneseq (!%p87_p2) }
   0x6   : > { %90 = sbr.rel (%p87_p2) target bundleno = 1220 (0x4c4), region = 24  ;;  %891 = vmatprep.subr.mxu0 (!%p87_p2), %v979_v0  ;;  %893 = vmatprep.mubr.msk.f32.mxu0 (!%p87_p2), %vm980_vm0, %v979_v0  ;;  %s982_s13 = smov (!%p87_p2), 64   ;;  %vm795_vm3 = vcmask (!%p87_p2), 130048   ;;  %vm797_vm4 = vcmask (!%p87_p2), 195584   ;;  %vm799_vm5 = vcmask (!%p87_p2), 261120  }
   0x7   : > { %896 = vmatprep.subr.mxu1 (!%p87_p2), %v979_v0  ;;  %898 = vmatprep.mubr.msk.f32.mxu1 (!%p87_p2), %vm980_vm0, %v979_v0  ;;  %s983_s14 = smov (!%p87_p2), 88   ;;  %s984_s15 = smov (!%p87_p2), 120   ;;  %v194_v5 = vand.u32 (!%p87_p2), 127, %v193_v4 }
   0x8   : > { %s985_s16 = smov (!%p87_p2), 80   ;;  %s986_s17 = smov (!%p87_p2), 112  }
   0x9   : > { %s987_s18 = smov (!%p87_p2), 72   ;;  %s988_s19 = smov (!%p87_p2), 104   ;;  %vm195_vm2 = vcmp.lt.s32.totalorder (!%p87_p2), %v194_v5, 5 }
   0xa   : > { %s989_s20 = smov (!%p87_p2), 56   ;;  %s990_s21 = smov (!%p87_p2), 48  }
   0xb   : > { %s991_s22 = smov (!%p87_p2), 40   ;;  %s992_s23 = smov (!%p87_p2), 8  }
   0xc   : > { %s993_s24 = smov (!%p87_p2), 16   ;;  %s994_s25 = smov (!%p87_p2), 24  }
   0xd   : > { %s1099_s7 = smov (!%p104_p3, %s854_s7), 1 }
   0xe   : > { %s859_s8 = sshll.u32 %s1099_s7, 3 }
   0xf   : > { %s107_s11 = scalar_lea.vmem %s1096_s0, %s859_s8  ;;  %s111_s28 = scalar_lea.vmem %s1097_s1, %s859_s8 }
  0x10   : > { %v1027_v1 = vld [vmem:[%s107_s11] sm:$0xff] }
  0x11   : > { %115 = vrot.lane.b32.xlu0 %v1027_v1, %s981_s12  ;;  %v113_v3 = vmul.f32 0.35355338, %v1027_v1  ;;  %206 = vrot.lane.b32.xlu1 %v1027_v1, %s982_s13 }
  0x15   : > { %286 = vrot.lane.b32.xlu1 %v1027_v1, %s983_s14 }
  0x19   : > { %284 = vrot.lane.b32.xlu1 %v113_v3, %s984_s15 }
  0x1d   : > { %452 = vrot.lane.b32.xlu1 %v1027_v1, %s985_s16 }
  0x21   : > { %450 = vrot.lane.b32.xlu1 %v113_v3, %s986_s17 }
  0x25   : > { %618 = vrot.lane.b32.xlu1 %v1027_v1, %s987_s18 }
  0x29   : > { %616 = vrot.lane.b32.xlu1 %v113_v3, %s988_s19 }
  0x83   : > { %v116_v2 = vpop.permute.xlu0 %115  ;;  %v207_v10 = vpop.permute.xlu1 %206 }
  0x84   : > { %892 = vmatpush3.xpose.msk.msra.mxu0 %vm117_vm1, %v116_v2  ;;  %897 = vmatpush3.msra.mxu1 %v207_v10 }
  0x85   : > { %906 = vmatprep.subr.mxu0 %v979_v0  ;;  %901 = vmatprep.subr.mxu1 %v979_v0 }
  0x87   : > { %894 = vmatmul.mubr.msk.f32.vlgmr.msra.gmra.mrb[0].mxu0 %vm117_vm1, %v113_v3  ;;  %v287_v11 = vpop.permute.xlu1 %286 }
  0x88   : > { %908 = vmatprep.mubr.msk.f32.mxu0 %vm980_vm0, %v979_v0 }
  0x8b   : > { %v285_v14 = vpop.permute.xlu1 %284 }
  0x8f   : > { %v453_v16 = vpop.permute.xlu1 %452 }
  0x93   : > { %v451_v17 = vpop.permute.xlu1 %450 }
  0x97   : > { %v619_v19 = vpop.permute.xlu1 %618 }
  0x9b   : > { %v617_v20 = vpop.permute.xlu1 %616 }
 0x15a   : > { %v189_v6 = vpop.f32.mrb[0].mxu0 }
 0x15b   : > { %v196_v7 = vsel %vm195_vm2, %v189_v6, -1e+30  ;;  %v895_v8 = vpop.f32.mrb[1].mxu0 }
 0x15c   : > { %v197_v9 = vsel %vm117_vm1, %v196_v7, -inf }
 0x15d   : > { %198 = vmax.xlane.f32.xlu0 %v197_v9 }
 0x173   : > { %372 = vrot.lane.b32.xlu0 %v1027_v1, %s989_s20 }
 0x1ea   : > { %v199_v12 = vpop.xlane.xlu0 %198 }
 0x1eb   : > { %v200_v13 = vsub.f32 %v196_v7, %v199_v12 }
 0x1ed   : > { %v201_v15 = vmul.f32 1.442695, %v200_v13 }
 0x1ee   : > { %v373_v21 = vpop.permute.xlu0 %372 }
 0x1ef   : > { %955 = vpow2.f32 %v201_v15  ;;  %907 = vmatpush3.msra.mxu0 %v373_v21 }
 0x1f0   : > { %916 = vmatprep.subr.mxu0 %v979_v0 }
 0x1f9   : > { %v1044_v18 = vpop.eup %955 }
 0x1fa   : > { %899 = vmatmul.mubr.msk.f32.vlgmr.msra.gmra.mrb[0].mxu1 %vm117_vm1, %v1044_v18  ;;  %v203_v53 = vsel %vm117_vm1, %v1044_v18, 0.0 }
 0x1fb   : > { %902 = vmatpush3.xpose.msk.msra.mxu1 %vm117_vm1, %v287_v11  ;;  %903 = vmatprep.mubr.msk.f32.mxu1 %vm980_vm0, %v979_v0 }
 0x1fc   : > { %911 = vmatprep.subr.mxu1 %v979_v0 }
 0x1fe   : > { %904 = vmatmul.mubr.msk.f32.vlgmr.msra.gmra.mrb[2].mxu1 %vm117_vm1, %v285_v14 }
 0x1ff   : > { %912 = vmatpush3.xpose.msk.msra.mxu1 %vm117_vm1, %v453_v16  ;;  %913 = vmatprep.mubr.msk.f32.mxu1 %vm980_vm0, %v979_v0 }
 0x200   : > { %921 = vmatprep.subr.mxu1 %v979_v0 }
 0x202   : > { %914 = vmatmul.mubr.msk.f32.vlgmr.msra.gmra.mrb[4].mxu1 %vm117_vm1, %v451_v17 }
 0x203   : > { %922 = vmatpush3.xpose.msk.msra.mxu1 %vm117_vm1, %v619_v19  ;;  %923 = vmatprep.mubr.msk.f32.mxu1 %vm980_vm0, %v979_v0 }
 0x206   : > { %924 = vmatmul.mubr.msk.f32.vlgmr.msra.gmra.mrb[6].mxu1 %vm117_vm1, %v617_v20 }
 0x2cd   : > { %v1063_v22 = vpop.f32.mrb[0].mxu1 }
 0x2ce   : > { %v900_v23 = vpop.f32.mrb[1].mxu1 }
 0x2d1   : > { %v358_v24 = vpop.f32.mrb[2].mxu1 }
 0x2d2   : > { %v362_v25 = vsel %vm195_vm2, %v358_v24, -1e+30  ;;  %v905_v26 = vpop.f32.mrb[3].mxu1 }
 0x2d3   : > { %v363_v27 = vsel %vm117_vm1, %v362_v25, -inf }
 0x2d4   : > { %364 = vmax.xlane.f32.xlu1 %v363_v27 }
 0x2d5   : > { %v524_v28 = vpop.f32.mrb[4].mxu1 }
 0x2d6   : > { %v528_v29 = vsel %vm195_vm2, %v524_v28, -1e+30  ;;  %v915_v30 = vpop.f32.mrb[5].mxu1 }
 0x2d7   : > { %v529_v31 = vsel %vm117_vm1, %v528_v29, -inf }
 0x2d8   : > { %530 = vmax.xlane.f32.xlu0 %v529_v31 }
 0x2d9   : > { %v690_v32 = vpop.f32.mrb[6].mxu1 }
 0x2da   : > { %v694_v33 = vsel %vm195_vm2, %v690_v32, -1e+30  ;;  %v925_v34 = vpop.f32.mrb[7].mxu1 }
 0x2db   : > { %v695_v35 = vsel %vm117_vm1, %v694_v33, -inf }
 0x2dc   : > { %696 = vmax.xlane.f32.xlu0 %v695_v35 }
 0x2e5   : > { %538 = vrot.lane.b32.xlu1 %v1027_v1, %s990_s21 }
 0x2f2   : > { %704 = vrot.lane.b32.xlu0 %v1027_v1, %s991_s22 }
 0x361   : > { %v365_v36 = vpop.xlane.xlu1 %364 }
 0x362   : > { %v366_v37 = vsub.f32 %v362_v25, %v365_v36 }
 0x364   : > { %v367_v38 = vmul.f32 1.442695, %v366_v37 }
 0x365   : > { %v531_v39 = vpop.xlane.xlu0 %530  ;;  %v539_v45 = vpop.permute.xlu1 %538 }
 0x366   : > { %957 = vpow2.f32 %v367_v38  ;;  %v532_v40 = vsub.f32 %v528_v29, %v531_v39 }
 0x368   : > { %v533_v41 = vmul.f32 1.442695, %v532_v40 }
 0x369   : > { %v697_v42 = vpop.xlane.xlu0 %696 }
 0x36a   : > { %959 = vpow2.f32 %v533_v41  ;;  %v698_v43 = vsub.f32 %v694_v33, %v697_v42 }
 0x36c   : > { %v699_v44 = vmul.f32 1.442695, %v698_v43 }
 0x36d   : > { %v705_v48 = vpop.permute.xlu0 %704 }
 0x36e   : > { %961 = vpow2.f32 %v699_v44 }
 0x370   : > { %v958_v46 = vpop.eup %957 }
 0x371   : > { %909 = vmatmul.mubr.msk.f32.vlgmr.msra.gmra.mrb[2].mxu0 %vm117_vm1, %v958_v46  ;;  %v369_v47 = vsel %vm117_vm1, %v958_v46, 0.0 }
 0x372   : > { %917 = vmatpush3.msra.mxu0 %v539_v45  ;;  %370 = vadd.xlane.f32.xlu0 %v369_v47 }
 0x373   : > { %918 = vmatprep.mubr.msk.f32.mxu0 %vm980_vm0, %v979_v0  ;;  %926 = vmatprep.subr.mxu0 %v979_v0 }
 0x374   : > { %v960_v49 = vpop.eup %959 }
 0x375   : > { %919 = vmatmul.mubr.msk.f32.vlgmr.msra.gmra.mrb[4].mxu0 %vm117_vm1, %v960_v49  ;;  %v535_v50 = vsel %vm117_vm1, %v960_v49, 0.0 }
 0x376   : > { %927 = vmatpush3.msra.mxu0 %v705_v48  ;;  %536 = vadd.xlane.f32.xlu1 %v535_v50 }
 0x377   : > { %928 = vmatprep.mubr.msk.f32.mxu0 %vm980_vm0, %v979_v0 }
 0x378   : > { %v962_v51 = vpop.eup %961 }
 0x379   : > { %929 = vmatmul.mubr.msk.f32.vlgmr.msra.gmra.mrb[6].mxu0 %vm117_vm1, %v962_v51  ;;  %v701_v52 = vsel %vm117_vm1, %v962_v51, 0.0 }
 0x37a   : > { %702 = vadd.xlane.f32.xlu0 %v701_v52 }
 0x37e   : > { %204 = vadd.xlane.f32.xlu0 %v203_v53 }
 0x3ff   : > { %v371_v54 = vpop.xlane.xlu0 %370 }
 0x400   : > { %963 = vrcp.f32 %v371_v54 }
 0x403   : > { %v537_v55 = vpop.xlane.xlu1 %536 }
 0x404   : > { %965 = vrcp.f32 %v537_v55 }
 0x407   : > { %v703_v56 = vpop.xlane.xlu0 %702 }
 0x408   : > { %967 = vrcp.f32 %v703_v56 }
 0x40a   : > { %v964_v57 = vpop.eup %963 }
 0x40b   : > { %v205_v5 = vpop.xlane.xlu0 %204 }
 0x40c   : > { %969 = vrcp.f32 %v205_v5 }
 0x40e   : > { %v966_v61 = vpop.eup %965 }
 0x412   : > { %v968_v1 = vpop.eup %967 }
 0x416   : > { %v970_v6 = vpop.eup %969 }
 0x417   : > { %v283_v8 = vmul.f32 %v970_v6, %v1063_v22 }
 0x444   : > { %v444_v58 = vpop.f32.mrb[2].mxu0 }
 0x445   : > { %v449_v59 = vmul.f32 %v964_v57, %v444_v58  ;;  %v910_v60 = vpop.f32.mrb[3].mxu0 }
 0x447   : > { %783 = vrot.lane.b32.xlu0 %v449_v59, %s992_s23 }
 0x448   : > { %v610_v62 = vpop.f32.mrb[4].mxu0 }
 0x449   : > { %v615_v63 = vmul.f32 %v966_v61, %v610_v62  ;;  %v920_v0 = vpop.f32.mrb[5].mxu0 }
 0x44b   : > { %787 = vrot.lane.b32.xlu1 %v615_v63, %s993_s24 }
 0x44c   : > { %v776_v2 = vpop.f32.mrb[6].mxu0 }
 0x44d   : > { %v781_v3 = vmul.f32 %v968_v1, %v776_v2  ;;  %v930_v4 = vpop.f32.mrb[7].mxu0 }
 0x44f   : > { %791 = vrot.lane.b32.xlu0 %v781_v3, %s994_s25 }
 0x4b9   : > { %v784_v7 = vpop.permute.xlu0 %783 }
 0x4ba   : > { %v794_v10 = vsel %vm117_vm1, %v283_v8, %v784_v7 }
 0x4bd   : > { %v788_v9 = vpop.permute.xlu1 %787 }
 0x4be   : > { %v796_v11 = vsel %vm795_vm3, %v794_v10, %v788_v9 }
 0x4c1   : > { %v792_v12 = vpop.permute.xlu0 %791 }
 0x4c2   : > { %v798_v13 = vsel %vm797_vm4, %v796_v11, %v792_v12 }
 0x4c3   : > { %800 = vst.msk [vmem:[%s111_s28] sm:$0xff] %vm799_vm5, %v798_v13 }
 0x4c4 PF: > { %s11_s6 = sadd.s32 1, %s977_s6  }
 0x4c5   : > { %p8_p4 = scmp.ge.s32.totalorder %s11_s6, 4  }
 0x4c7   :  { %10 = sbr.rel (!%p8_p4) target bundleno = 1 (0x1), region = 54 }

// kernel: vit_forward.17
= control target key start
LH: loop header
LB: loop body
LE: loop exit
PB: predicated region body
PF: predicated region fallthrough
CT: control target
= control target key end

     0   :  { %vm121_vm0 = vcmask 261120   ;;  %s308_s1 = inlined_call_operand.vmem [shape: f32[128,32], index: 1, kind: input, shape index: {}]   ;;  %s309_s0 = inlined_call_operand.vmem [shape: f32[16,128], index: 0, kind: input, shape index: {}]   ;;  %s310_s2 = inlined_call_operand.vmem [shape: f32[1,32], index: 2, kind: input, shape index: {}]   ;;  %s311_s3 = inlined_call_operand.vmem [shape: f32[16,32], index: 3, kind: input, shape index: {}]   ;;  %s312_s4 = inlined_call_operand.vmem [shape: f32[16,32], index: 4, kind: output, shape index: {}]  }
   0x1   :  { %v19_v0 = vld [vmem:[%s308_s1] sm:$0xff]  ;;  %v20_v1 = vld [vmem:[%s308_s1 + $0x8] sm:$0xff]  ;;  %v21_v2 = vld [vmem:[%s308_s1 + $0x10] sm:$0xff] }
   0x2   :  { %v182_v3 = vpack.c.bf16 %v20_v1, %v19_v0  ;;  %v22_v4 = vld [vmem:[%s308_s1 + $0x18] sm:$0xff]  ;;  %v23_v6 = vld [vmem:[%s308_s1 + $0x20] sm:$0xff]  ;;  %v24_v7 = vld [vmem:[%s308_s1 + $0x28] sm:$0xff] }
   0x3   :  { %v186_v5 = vpack.c.bf16 %v22_v4, %v21_v2  ;;  %v190_v8 = vpack.c.bf16 %v24_v7, %v23_v6  ;;  %v17_v9 = vld [vmem:[%s309_s0] sm:$0xff]  ;;  %v25_v10 = vld [vmem:[%s308_s1 + $0x30] sm:$0xff]  ;;  %v26_v11 = vld [vmem:[%s308_s1 + $0x38] sm:$0xff] }
   0x4   :  { %183 = vmatprep.subr.bf16.mxu0 %v182_v3  ;;  %179 = vmatprep.mubr.f32.mxu0 %v17_v9  ;;  %v194_v12 = vpack.c.bf16 %v26_v11, %v25_v10  ;;  %v27_v13 = vld [vmem:[%s308_s1 + $0x40] sm:$0xff]  ;;  %v28_v14 = vld [vmem:[%s308_s1 + $0x48] sm:$0xff]  ;;  %v29_v16 = vld [vmem:[%s308_s1 + $0x50] sm:$0xff] }
   0x5   :  { %185 = vmatpush3.bf16.msra.mxu0 %v182_v3  ;;  %v198_v15 = vpack.c.bf16 %v28_v14, %v27_v13  ;;  %v30_v17 = vld [vmem:[%s308_s1 + $0x58] sm:$0xff]  ;;  %v31_v19 = vld [vmem:[%s308_s1 + $0x60] sm:$0xff]  ;;  %v32_v20 = vld [vmem:[%s308_s1 + $0x68] sm:$0xff] }
   0x6   :  { %187 = vmatprep.subr.bf16.mxu0 %v186_v5  ;;  %v202_v18 = vpack.c.bf16 %v30_v17, %v29_v16  ;;  %v206_v21 = vpack.c.bf16 %v32_v20, %v31_v19  ;;  %v33_v22 = vld [vmem:[%s308_s1 + $0x70] sm:$0xff]  ;;  %v34_v23 = vld [vmem:[%s308_s1 + $0x78] sm:$0xff]  ;;  %v18_v25 = vld [vmem:[%s309_s0 + $0x8] sm:$0xff] }
   0x7   :  { %v210_v24 = vpack.c.bf16 %v34_v23, %v33_v22  ;;  %v128_v26 = vld [vmem:[%s310_s2] ss:$0 sm:$0xff]  ;;  %v118_v28 = vld [vmem:[%s311_s3 + $0x8] sm:$0xff] }
   0x8   :  { %v117_v31 = vld [vmem:[%s311_s3] sm:$0xff] }
   0x9   :  { %189 = vmatpush3.bf16.msra.mxu0 %v186_v5 }
   0xa   :  { %191 = vmatprep.subr.bf16.mxu0 %v190_v8 }
   0xd   :  { %193 = vmatpush3.bf16.msra.mxu0 %v190_v8 }
   0xe   :  { %195 = vmatprep.subr.bf16.mxu0 %v194_v12 }
  0x11   :  { %197 = vmatpush3.bf16.msra.mxu0 %v194_v12 }
  0x12   :  { %199 = vmatprep.subr.bf16.mxu0 %v198_v15 }
  0x15   :  { %201 = vmatpush3.bf16.msra.mxu0 %v198_v15 }
  0x16   :  { %203 = vmatprep.subr.bf16.mxu0 %v202_v18 }
  0x19   :  { %205 = vmatpush3.bf16.msra.mxu0 %v202_v18 }
  0x1a   :  { %207 = vmatprep.subr.bf16.mxu0 %v206_v21 }
  0x1d   :  { %209 = vmatpush3.bf16.msra.mxu0 %v206_v21 }
  0x1e   :  { %211 = vmatprep.subr.bf16.mxu0 %v210_v24 }
  0x21   :  { %213 = vmatpush3.bf16.msra.mxu0 %v210_v24 }
  0x24   :  { %180 = vmatmul.mubr.f32.vlgmr.msra.gmra.mrb[0].mxu0 %v18_v25 }
  0xf7   :  { %v181_v27 = vpop.f32.mrb[0].mxu0 }
  0xf8   :  { %v114_v29 = vadd.f32 %v181_v27, %v128_v26  ;;  %v108_v30 = vpop.f32.mrb[1].mxu0 }
  0xf9   :  { %v109_v32 = vadd.f32 %v128_v26, %v108_v30 }
  0xfa   :  { %v120_v33 = vadd.f32 %v118_v28, %v114_v29 }
  0xfb   :  { %v119_v34 = vadd.f32 %v117_v31, %v109_v32 }
  0xfc   :  { %123 = vst.msk [vmem:[%s312_s4 + $0x8] sm:$0xff] %vm121_vm0, %v120_v33 }
  0xfd   :  { %122 = vst.msk [vmem:[%s312_s4] sm:$0xff] %vm121_vm0, %v119_v34 }

// kernel: vit_forward.16
= control target key start
LH: loop header
LB: loop body
LE: loop exit
PB: predicated region body
PF: predicated region fallthrough
CT: control target
= control target key end

     0   :  { %vm22_vm0 = vcmask 261120   ;;  %s291_s0 = inlined_call_operand.vmem [shape: f32[16,32], index: 0, kind: input, shape index: {}]   ;;  %s292_s3 = inlined_call_operand.vmem [shape: f32[32,128], index: 3, kind: input, shape index: {}]   ;;  %s293_s1 = inlined_call_operand.vmem [shape: f32[1,32], index: 1, kind: input, shape index: {}]   ;;  %s294_s2 = inlined_call_operand.vmem [shape: f32[1,32], index: 2, kind: input, shape index: {}]   ;;  %s295_s4 = inlined_call_operand.vmem [shape: f32[1,128], index: 4, kind: input, shape index: {}]   ;;  %s296_s5 = inlined_call_operand.vmem [shape: f32[16,128], index: 5, kind: output, shape index: {}]  }
   0x1   :  { %v20_v0 = vld [vmem:[%s291_s0] sm:$0xff]  ;;  %v21_v1 = vld [vmem:[%s291_s0 + $0x8] sm:$0xff]  ;;  %v70_v16 = vld [vmem:[%s292_s3 + $0x10] sm:$0xff] }
   0x2   :  { %v23_v2 = vsel %vm22_vm0, %v20_v0, 0.0  ;;  %v26_v3 = vsel %vm22_vm0, %v21_v1, 0.0  ;;  %v68_v14 = vld [vmem:[%s292_s3] sm:$0xff]  ;;  %v69_v15 = vld [vmem:[%s292_s3 + $0x8] sm:$0xff]  ;;  %v71_v18 = vld [vmem:[%s292_s3 + $0x18] sm:$0xff] }
   0x3   :  { %24 = vadd.xlane.f32.xlu0 %v23_v2  ;;  %v206_v17 = vpack.c.bf16 %v69_v15, %v68_v14  ;;  %v210_v19 = vpack.c.bf16 %v71_v18, %v70_v16  ;;  %v184_v27 = vld [vmem:[%s293_s1] ss:$0 sm:$0xff] }
   0x4   :  { %v185_v29 = vld [vmem:[%s294_s2] ss:$0 sm:$0xff] }
   0x5   :  { %207 = vmatprep.subr.bf16.mxu0 %v206_v17  ;;  %v186_v36 = vld [vmem:[%s295_s4] ss:$0 sm:$0xff] }
   0x6   :  { %209 = vmatpush3.bf16.msra.mxu0 %v206_v17 }
   0x7   :  { %27 = vadd.xlane.f32.xlu0 %v26_v3  ;;  %211 = vmatprep.subr.bf16.mxu0 %v210_v19 }
   0xa   :  { %213 = vmatpush3.bf16.msra.mxu0 %v210_v19 }
  0x90   :  { %v25_v4 = vpop.xlane.xlu0 %24 }
  0x91   :  { %v30_v5 = vmul.f32 0.03125, %v25_v4 }
  0x93   :  { %v32_v6 = vsub.f32 %v20_v0, %v30_v5 }
  0x94   :  { %v28_v7 = vpop.xlane.xlu0 %27 }
  0x95   :  { %v31_v8 = vmul.f32 0.03125, %v28_v7  ;;  %v34_v9 = vmul.f32 %v32_v6, %v32_v6 }
  0x97   :  { %v33_v10 = vsub.f32 %v21_v1, %v31_v8  ;;  %v36_v11 = vsel %vm22_vm0, %v34_v9, 0.0 }
  0x98   :  { %37 = vadd.xlane.f32.xlu1 %v36_v11 }
  0x99   :  { %v35_v12 = vmul.f32 %v33_v10, %v33_v10 }
  0x9b   :  { %v39_v13 = vsel %vm22_vm0, %v35_v12, 0.0 }
  0x9c   :  { %40 = vadd.xlane.f32.xlu1 %v39_v13 }
 0x125   :  { %v38_v20 = vpop.xlane.xlu1 %37 }
 0x126   :  { %v42_v21 = vmul.f32 0.03125, %v38_v20 }
 0x128   :  { %v44_v22 = vadd.f32 1e-06, %v42_v21 }
 0x129   :  { %v41_v23 = vpop.xlane.xlu1 %40 }
 0x12a   :  { %214 = vrsqrt.f32 %v44_v22  ;;  %v43_v24 = vmul.f32 0.03125, %v41_v23 }
 0x12c   :  { %v45_v25 = vadd.f32 1e-06, %v43_v24 }
 0x12e   :  { %216 = vrsqrt.f32 %v45_v25 }
 0x134   :  { %v215_v26 = vpop.eup %214 }
 0x135   :  { %v48_v28 = vmul.f32 %v215_v26, %v32_v6 }
 0x137   :  { %v57_v30 = vmul.f32 %v184_v27, %v48_v28 }
 0x138   :  { %v217_v31 = vpop.eup %216 }
 0x139   :  { %v49_v32 = vmul.f32 %v217_v31, %v33_v10  ;;  %v66_v33 = vadd.f32 %v185_v29, %v57_v30 }
 0x13b   :  { %v58_v34 = vmul.f32 %v184_v27, %v49_v32  ;;  %203 = vmatprep.mubr.msk.f32.mxu0 %vm22_vm0, %v66_v33 }
 0x13d   :  { %v67_v35 = vadd.f32 %v185_v29, %v58_v34 }
 0x13f   :  { %204 = vmatmul.mubr.msk.f32.vlgmr.msra.gmra.mrb[0].mxu0 %vm22_vm0, %v67_v35 }
 0x212   :  { %v205_v37 = vpop.f32.mrb[0].mxu0 }
 0x213   :  { %v157_v38 = vadd.f32 %v205_v37, %v186_v36  ;;  %v151_v39 = vpop.f32.mrb[1].mxu0 }
 0x214   :  { %v152_v40 = vadd.f32 %v186_v36, %v151_v39 }
 0x215   :  { %v163_v41 = vmul.f32 0.044715, %v157_v38  ;;  %v161_v53 = vmul.f32 0.5, %v157_v38 }
 0x216   :  { %v162_v42 = vmul.f32 0.044715, %v152_v40  ;;  %v160_v55 = vmul.f32 0.5, %v152_v40 }
 0x217   :  { %v165_v43 = vmul.f32 %v163_v41, %v157_v38 }
 0x218   :  { %v164_v44 = vmul.f32 %v162_v42, %v152_v40 }
 0x219   :  { %v167_v45 = vmul.f32 %v165_v43, %v157_v38 }
 0x21a   :  { %v166_v46 = vmul.f32 %v164_v44, %v152_v40 }
 0x21b   :  { %v169_v47 = vadd.f32 %v167_v45, %v157_v38 }
 0x21c   :  { %v168_v48 = vadd.f32 %v166_v46, %v152_v40 }
 0x21d   :  { %v171_v49 = vmul.f32 0.7978846, %v169_v47 }
 0x21e   :  { %v170_v50 = vmul.f32 0.7978846, %v168_v48 }
 0x21f   :  { %218 = vtanh.f32 %v171_v49 }
 0x220   :  { %220 = vtanh.f32 %v170_v50 }
 0x229   :  { %v219_v51 = vpop.eup %218 }
 0x22a   :  { %v221_v52 = vpop.eup %220  ;;  %v175_v54 = vadd.f32 1.0, %v219_v51 }
 0x22b   :  { %v174_v56 = vadd.f32 1.0, %v221_v52 }
 0x22c   :  { %v177_v57 = vmul.f32 %v175_v54, %v161_v53 }
 0x22d   :  { %v176_v58 = vmul.f32 %v174_v56, %v160_v55 }
 0x22e   :  { %179 = vst [vmem:[%s296_s5 + $0x8] sm:$0xff] %v177_v57 }
 0x22f   :  { %178 = vst [vmem:[%s296_s5] sm:$0xff] %v176_v58 }

// kernel: vit_forward.23
= control target key start
LH: loop header
LB: loop body
LE: loop exit
PB: predicated region body
PF: predicated region fallthrough
CT: control target
= control target key end

     0   :  { %vm22_vm0 = vcmask 254976   ;;  %s280_s0 = inlined_call_operand.vmem [shape: f32[2,32], index: 0, kind: input, shape index: {}]   ;;  %s281_s1 = inlined_call_operand.vmem [shape: f32[1,32], index: 1, kind: input, shape index: {}]   ;;  %s282_s2 = inlined_call_operand.vmem [shape: f32[1,32], index: 2, kind: input, shape index: {}]   ;;  %s283_s3 = inlined_call_operand.vmem [shape: f32[32,10], index: 3, kind: input, shape index: {}]   ;;  %s284_s4 = inlined_call_operand.vmem [shape: f32[1,10], index: 4, kind: input, shape index: {}]   ;;  %s285_s5 = inlined_call_operand.hbm [shape: f32[2,10], index: 5, kind: output, shape index: {}]  }
   0x1   :  { %v21_v0 = vld [vmem:[%s280_s0] sm:$0x3] }
   0x2   :  { %10 = vsyncpa [#allocation3], 0  ;;  %v23_v1 = vsel %vm22_vm0, %v21_v0, 0.0  ;;  %v53_v7 = vld [vmem:[%s283_s3] sm:$0xff]  ;;  %v54_v8 = vld [vmem:[%s283_s3 + $0x8] sm:$0xff]  ;;  %v210_v10 = vmov 0.0|0.0  }
   0x3   :  { %24 = vadd.xlane.f32.xlu0 %v23_v1  ;;  %v55_v9 = vld [vmem:[%s283_s3 + $0x10] sm:$0xff]  ;;  %174 = vmatprep.subr.bf16.mxu0 %v210_v10  ;;  %v175_v11 = vpack.c.bf16 %v54_v8, %v53_v7  ;;  %v56_v12 = vld [vmem:[%s283_s3 + $0x18] sm:$0xff]  ;;  %vm211_vm1 = vmmov 0   ;;  %v212_v13 = vmov 0.0   ;;  %v154_v19 = vld [vmem:[%s281_s1] ss:$0 sm:$0xff] }
   0x4   :  { %171 = vmatprep.mubr.msk.f32.mxu0 %vm211_vm1, %v212_v13  ;;  %v178_v14 = vpack.c.bf16 %v56_v12, %v55_v9  ;;  %v155_v21 = vld [vmem:[%s282_s2] ss:$0 sm:$0xff]  ;;  %vm64_vm2 = vcmask 261120   ;;  %s213_s7 = smov [#allocation2]   ;;  %vm138_vm3 = vcmask 74752  }
   0x5   :  { %176 = vmatpush3.bf16.msra.mxu0 %v175_v11  ;;  %v156_v24 = vld [vmem:[%s284_s4] ss:$0 sm:$0xff]  ;;  %s146_s8 = sshll.u32 %s213_s7, 4  ;;  %s147_s8 = int_to_ptr.vmem [resolvable:$true] %s146_s8 }
   0x6   :  { %177 = vmatprep.subr.bf16.mxu0 %v210_v10  ;;  %s186_s1 = scalar_lea.vmem %s147_s8, 32  ;;  %p191_p1 = scmp.lt.s32.totalorder %s147_s8, %s147_s8 }
   0x7   :  { %p187_p0 = scmp.ne.s32.totalorder %s147_s8, %s186_s1  ;;  %p192_p2 = scmp.lt.s32.totalorder %s186_s1, %s186_s1 }
   0x9   :  { %179 = vmatpush3.bf16.msra.mxu0 %v178_v14  ;;  %p193_p3 = por %p192_p2, %p191_p1 }
   0xb   :  { %p194_p4 = pnand %p193_p3, %p187_p0 }
  0x90   :  { %v25_v2 = vpop.xlane.xlu0 %24 }
  0x91   :  { %v27_v3 = vmul.f32 0.03125, %v25_v2 }
  0x93   :  { %v28_v4 = vsub.f32 %v21_v0, %v27_v3 }
  0x95   :  { %v29_v5 = vmul.f32 %v28_v4, %v28_v4 }
  0x97   :  { %v30_v6 = vsel %vm22_vm0, %v29_v5, 0.0 }
  0x98   :  { %31 = vadd.xlane.f32.xlu0 %v30_v6 }
 0x125   :  { %v32_v15 = vpop.xlane.xlu0 %31 }
 0x126   :  { %v33_v16 = vmul.f32 0.03125, %v32_v15 }
 0x128   :  { %v34_v17 = vadd.f32 1e-06, %v33_v16 }
 0x12a   :  { %184 = vrsqrt.f32 %v34_v17 }
 0x134   :  { %v185_v18 = vpop.eup %184 }
 0x135   :  { %v36_v20 = vmul.f32 %v185_v18, %v28_v4 }
 0x137   :  { %v44_v22 = vmul.f32 %v154_v19, %v36_v20 }
 0x139   :  { %v52_v23 = vadd.f32 %v155_v21, %v44_v22 }
 0x13b   :  { %172 = vmatmul.mubr.msk.f32.vlgmr.msra.gmra.mrb[0].mxu0 %vm64_vm2, %v52_v23 }
 0x20e   :  { %v134_v25 = vpop.f32.mrb[0].mxu0 }
 0x20f   :  { %v135_v26 = vadd.f32 %v156_v24, %v134_v25  ;;  %v173_v27 = vpop.f32.mrb[1].mxu0 }
 0x211   :  { %139 = vst.msk [vmem:[#allocation2] sm:$0x3] %vm138_vm3, %v135_v26 }
 0x212   :  { %197 = shalt.err (!%p194_p4)
}
 0x213   :  { %s198_s10 = scalar_lea.hbm %s285_s5, 32 }
 0x214   :  { %p199_p5 = scmp.ne.s32.totalorder %s285_s5, %s198_s10  ;;  %p202_p6 = scmp.lt.u32.totalorder %s198_s10, %s285_s5 }
 0x216   :  { %p204_p7 = pnand %p202_p6, %p199_p5 }
 0x218   :  { %207 = shalt.err (!%p204_p7)
}
 0x219   :  { %149 = dma.vmem_to_hbm [thread:$0]  %s147_s8, 32, %s285_s5, [#allocation3]  }
 0x21a   :  { %208 = dma.done.wait [#allocation3], 32  }
 0x21b   :  { %209 = vsyncadd [#allocation3], 4294967264 }
 0x21c   :  { %153 = vsyncpa [#allocation3], 1 }

</bundles_post_ra>
